<compile_context>
chip_gen: v7x
topology: tpu7x:2x2x1
jax: 0.10.0
libtpu: 0.0.40
codegen_flags: <defaults>
</compile_context>

<pallas_src>
import numpy as np
import jax
import jax.numpy as jnp
from jax.experimental import pallas as pl

EPS = 1e-5
LANE = 128      # every channel dim padded to a full 128-lane vreg
K_STEM = 256    # stem im2col K = 7*7*3 = 147 -> padded to 2*128
FEAT_DIM = 64   # real channel count of the last block (== num_features)


# ------------------------------ fused Pallas kernel ------------------------------

def _fused_forward_kernel(
        cols_ref, ws_ref, bs_ref, gmp_ref,
        w11_ref, b11_ref, g1_ref, w12_ref, b12_ref, w13_ref, b13_ref,
        w1d_ref, b1d_ref,
        w21_ref, b21_ref, g2_ref, w22_ref, b22_ref, w23_ref, b23_ref,
        w2d_ref, b2d_ref, g2d_ref,
        agap_ref, out_ref):
    """Entire EmbeddingNet forward in one kernel; everything stays in VMEM.

    Convs are BN-folded matmuls on the MXU (bf16 inputs, f32 accumulation).  Spatial patch
    gathers / stride-2 subsampling are 0/1 gather-matrix matmuls, so the kernel needs only
    static, sublane-aligned slices — no strided or dynamic indexing.
    """
    f32, bf16 = jnp.float32, jnp.bfloat16

    def mm(a, b):
        return jnp.dot(a.astype(bf16), b.astype(bf16), preferred_element_type=f32)

    def conv1x1(x, w_ref, b_ref, relu):
        y = mm(x, w_ref[...]) + b_ref[...]
        return jnp.maximum(y, 0.0) if relu else y

    def conv3x3(x, g_ref, w_ref, b_ref, relu):
        pat = mm(g_ref[...], x)                       # (9*M, LANE) gathered taps (0 = padding)
        m = pat.shape[0] // 9
        acc = mm(pat[0:m, :], w_ref[0:LANE, :])
        for t in range(1, 9):
            acc = acc + mm(pat[t * m:(t + 1) * m, :],
                           w_ref[t * LANE:(t + 1) * LANE, :])
        y = acc + b_ref[...]
        return jnp.maximum(y, 0.0) if relu else y

    # stem: 7x7/s2 conv + BN + ReLU (lane-dense im2col matmul)
    x = jnp.maximum(mm(cols_ref[...], ws_ref[...]) + bs_ref[...], 0.0)      # (N*8*8, 128)

    # maxpool 3x3/s2/p1: max over 9 gathered tap slabs (zero padding is safe post-ReLU)
    pat = mm(gmp_ref[...], x)
    m = pat.shape[0] // 9
    y = pat[0:m, :]
    for t in range(1, 9):
        y = jnp.maximum(y, pat[t * m:(t + 1) * m, :])
    x = y                                                                    # (N*4*4, 128)

    # bottleneck 1 (stride 1); residual add + ReLU fused into the tail
    h = conv1x1(x, w11_ref, b11_ref, True)
    h = conv3x3(h, g1_ref, w12_ref, b12_ref, True)
    h = conv1x1(h, w13_ref, b13_ref, False)
    idn = conv1x1(x, w1d_ref, b1d_ref, False)
    x = jnp.maximum(h + idn, 0.0)                                            # (N*4*4, 128)

    # bottleneck 2 (stride 2)
    h = conv1x1(x, w21_ref, b21_ref, True)
    h = conv3x3(h, g2_ref, w22_ref, b22_ref, True)
    h = conv1x1(h, w23_ref, b23_ref, False)
    idn = conv1x1(mm(g2d_ref[...], x), w2d_ref, b2d_ref, False)              # stride-2 subsample
    x = jnp.maximum(h + idn, 0.0)                                            # (N*2*2, 128)

    # global average pool + flatten: per-batch averaging matrix (N, N*H*W)
    out_ref[...] = jnp.dot(agap_ref[...], x, preferred_element_type=f32)     # (N, 128)


# ----------------------------- weight / gather preparation -----------------------------

def _pad2(a, rows, cols):
    return jnp.pad(a, ((0, rows - a.shape[0]), (0, cols - a.shape[1])))


def _fold_bn(w, bn):
    gamma, beta, mean, var = bn
    a = gamma * jax.lax.rsqrt(var + EPS)
    bias = beta - mean * a
    return w * a[:, None, None, None], bias


def _prep_1x1(w, bn):
    w_eff, bias = _fold_bn(w, bn)
    cout, cin = w_eff.shape[:2]
    wm = _pad2(w_eff.reshape(cout, cin).T, LANE, LANE).astype(jnp.bfloat16)
    return wm, _pad2(bias.reshape(1, cout), 1, LANE)


def _prep_3x3(w, bn):
    w_eff, bias = _fold_bn(w, bn)
    cout, cin, kh, kw = w_eff.shape
    taps = [_pad2(w_eff[:, :, i, j].T, LANE, LANE)
            for i in range(kh) for j in range(kw)]
    wm = jnp.concatenate(taps, axis=0).astype(jnp.bfloat16)      # (kh*kw*LANE, LANE)
    return wm, _pad2(bias.reshape(1, cout), 1, LANE)


def _prep_stem(w, bn):
    w_eff, bias = _fold_bn(w, bn)
    cout, cin, kh, kw = w_eff.shape
    wm = jnp.transpose(w_eff, (2, 3, 1, 0)).reshape(kh * kw * cin, cout)
    wm = _pad2(wm, K_STEM, LANE).astype(jnp.bfloat16)
    return wm, _pad2(bias.reshape(1, cout), 1, LANE)


def _gather_mat(n, h, w, kh, kw, stride, pad):
    """0/1 matrix (kh*kw*n*ho*wo, n*h*w): G @ X gathers im2col taps; zero rows = zero padding."""
    ho = (h + 2 * pad - kh) // stride + 1
    wo = (w + 2 * pad - kw) // stride + 1
    m = n * ho * wo
    g = np.zeros((kh * kw * m, n * h * w), np.float32)
    for i in range(kh):
        for j in range(kw):
            t = i * kw + j
            for b in range(n):
                for oh in range(ho):
                    ih = oh * stride + i - pad
                    if not 0 <= ih < h:
                        continue
                    for ow in range(wo):
                        iw = ow * stride + j - pad
                        if 0 <= iw < w:
                            g[t * m + (b * ho + oh) * wo + ow,
                              (b * h + ih) * w + iw] = 1.0
    return g, ho, wo


def prepare_params(params, n, h, w):
    """Fold BN into weights, pad channels to 128 lanes, build gather / pooling matrices."""
    h1, w1 = (h + 6 - 7) // 2 + 1, (w + 6 - 7) // 2 + 1          # stem output spatial
    w_stem, b_stem = _prep_stem(params["stem_w"], params["stem_bn"])
    gmp_np, h2, w2 = _gather_mat(n, h1, w1, 3, 3, 2, 1)          # maxpool 3x3/s2/p1
    g1_np, _, _ = _gather_mat(n, h2, w2, 3, 3, 1, 1)             # block1 conv2 (s1)
    g2_np, h3, w3 = _gather_mat(n, h2, w2, 3, 3, 2, 1)           # block2 conv2 (s2)
    g2d_np, _, _ = _gather_mat(n, h2, w2, 1, 1, 2, 0)            # block2 downsample subsample

    blk1, blk2 = params["block1"], params["block2"]
    w11, b11 = _prep_1x1(blk1["w1"], blk1["bn1"])
    w12, b12 = _prep_3x3(blk1["w2"], blk1["bn2"])
    w13, b13 = _prep_1x1(blk1["w3"], blk1["bn3"])
    w1d, b1d = _prep_1x1(blk1["wd"], blk1["bnd"])
    w21, b21 = _prep_1x1(blk2["w1"], blk2["bn1"])
    w22, b22 = _prep_3x3(blk2["w2"], blk2["bn2"])
    w23, b23 = _prep_1x1(blk2["w3"], blk2["bn3"])
    w2d, b2d = _prep_1x1(blk2["wd"], blk2["bnd"])

    a_gap = np.zeros((n, n * h3 * w3), np.float32)
    for b in range(n):
        a_gap[b, b * h3 * w3:(b + 1) * h3 * w3] = 1.0 / (h3 * w3)

    bf = jnp.bfloat16
    return (w_stem, b_stem, jnp.asarray(gmp_np, bf),
            w11, b11, jnp.asarray(g1_np, bf), w12, b12, w13, b13, w1d, b1d,
            w21, b21, jnp.asarray(g2_np, bf), w22, b22, w23, b23, w2d, b2d,
            jnp.asarray(g2d_np, bf),
            jnp.asarray(a_gap, jnp.float32))


# --------------------------------- forward wrapper ---------------------------------

def _stem_cols(x_nhwc, kh=7, kw=7, stride=2, pad=3):
    """im2col of the (tiny) network input for the stem conv; K zero-padded to K_STEM lanes."""
    n, h, w, c = x_nhwc.shape
    xp = jnp.pad(x_nhwc, ((0, 0), (pad, pad), (pad, pad), (0, 0)))
    ho = (h + 2 * pad - kh) // stride + 1
    wo = (w + 2 * pad - kw) // stride + 1
    taps = [xp[:, i:i + stride * ho:stride, j:j + stride * wo:stride, :]
            for i in range(kh) for j in range(kw)]
    cols = jnp.stack(taps, axis=3).reshape(n * ho * wo, kh * kw * c)
    return jnp.pad(cols, ((0, 0), (0, K_STEM - kh * kw * c))).astype(jnp.bfloat16)


def embedding_net_forward(prep, x_nchw):
    """EmbeddingNet.forward: features(x) -> view(N, -1), as a single fused Pallas kernel."""
    x = jnp.transpose(x_nchw, (0, 2, 3, 1)).astype(jnp.float32)   # NCHW -> NHWC
    cols = _stem_cols(x)
    n = x.shape[0]
    out = pl.pallas_call(
        _fused_forward_kernel,
        out_shape=jax.ShapeDtypeStruct((n, LANE), jnp.float32),
    )(cols, *prep)
    return out[:, :FEAT_DIM]                                      # trim lane padding -> (N, num_features)


# --------------------------- parameter construction (deterministic) ---------------------------

def _conv_w(key, cout, cin, kh, kw):
    fan_in = cin * kh * kw
    return jax.random.normal(key, (cout, cin, kh, kw), jnp.float32) * (2.0 / fan_in) ** 0.5


def _bn_params(key, c):
    k1, k2, k3, k4 = jax.random.split(key, 4)
    gamma = 1.0 + 0.1 * jax.random.normal(k1, (c,), jnp.float32)
    beta = 0.1 * jax.random.normal(k2, (c,), jnp.float32)
    mean = 0.1 * jax.random.normal(k3, (c,), jnp.float32)
    var = 1.0 + 0.5 * jax.random.uniform(k4, (c,), jnp.float32)
    return (gamma, beta, mean, var)


def init_params(key):
    ks = iter(jax.random.split(key, 32))
    return {
        "stem_w": _conv_w(next(ks), 16, 3, 7, 7),
        "stem_bn": _bn_params(next(ks), 16),
        "block1": {
            "w1": _conv_w(next(ks), 8, 16, 1, 1), "bn1": _bn_params(next(ks), 8),
            "w2": _conv_w(next(ks), 8, 8, 3, 3),  "bn2": _bn_params(next(ks), 8),
            "w3": _conv_w(next(ks), 32, 8, 1, 1), "bn3": _bn_params(next(ks), 32),
            "wd": _conv_w(next(ks), 32, 16, 1, 1), "bnd": _bn_params(next(ks), 32),
        },
        "block2": {
            "w1": _conv_w(next(ks), 16, 32, 1, 1), "bn1": _bn_params(next(ks), 16),
            "w2": _conv_w(next(ks), 16, 16, 3, 3), "bn2": _bn_params(next(ks), 16),
            "w3": _conv_w(next(ks), 64, 16, 1, 1), "bn3": _bn_params(next(ks), 64),
            "wd": _conv_w(next(ks), 64, 32, 1, 1), "bnd": _bn_params(next(ks), 64),
        },
    }


if __name__ == "__main__":
    key = jax.random.PRNGKey(0)
    k_param, k_x = jax.random.split(key)
    params = init_params(k_param)
    x = jax.random.normal(k_x, (2, 3, 16, 16), jnp.float32)   # NCHW like PyTorch

    prep = prepare_params(params, x.shape[0], x.shape[2], x.shape[3])
    fwd = jax.jit(embedding_net_forward)
    out = jax.block_until_ready(fwd(prep, x))

    assert out.shape == (2, FEAT_DIM), out.shape
    assert bool(jnp.all(jnp.isfinite(out)))
    print("KERNEL_OK")
</pallas_src>

<mosaic_0001>
module attributes {stable_mosaic.version = 11 : i64} {
  func.func @_fused_forward_kernel(%arg0: memref<128x256xbf16, #tpu.memory_space<vmem>>, %arg1: memref<256x128xbf16, #tpu.memory_space<vmem>>, %arg2: memref<1x128xf32, #tpu.memory_space<vmem>>, %arg3: memref<288x128xbf16, #tpu.memory_space<vmem>>, %arg4: memref<128x128xbf16, #tpu.memory_space<vmem>>, %arg5: memref<1x128xf32, #tpu.memory_space<vmem>>, %arg6: memref<288x32xbf16, #tpu.memory_space<vmem>>, %arg7: memref<1152x128xbf16, #tpu.memory_space<vmem>>, %arg8: memref<1x128xf32, #tpu.memory_space<vmem>>, %arg9: memref<128x128xbf16, #tpu.memory_space<vmem>>, %arg10: memref<1x128xf32, #tpu.memory_space<vmem>>, %arg11: memref<128x128xbf16, #tpu.memory_space<vmem>>, %arg12: memref<1x128xf32, #tpu.memory_space<vmem>>, %arg13: memref<128x128xbf16, #tpu.memory_space<vmem>>, %arg14: memref<1x128xf32, #tpu.memory_space<vmem>>, %arg15: memref<72x32xbf16, #tpu.memory_space<vmem>>, %arg16: memref<1152x128xbf16, #tpu.memory_space<vmem>>, %arg17: memref<1x128xf32, #tpu.memory_space<vmem>>, %arg18: memref<128x128xbf16, #tpu.memory_space<vmem>>, %arg19: memref<1x128xf32, #tpu.memory_space<vmem>>, %arg20: memref<128x128xbf16, #tpu.memory_space<vmem>>, %arg21: memref<1x128xf32, #tpu.memory_space<vmem>>, %arg22: memref<8x32xbf16, #tpu.memory_space<vmem>>, %arg23: memref<2x8xf32, #tpu.memory_space<vmem>>, %arg24: memref<2x128xf32, #tpu.memory_space<vmem>>) attributes {dimension_semantics = [], scalar_prefetch = 0 : i64, scratch_operands = 0 : i64, tpu.core_type = #tpu.core_type<tc>} {
    %c0 = arith.constant 0 : index
    %c0_0 = arith.constant 0 : index
    %0 = vector.load %arg0[%c0, %c0_0] : memref<128x256xbf16, #tpu.memory_space<vmem>>, vector<128x256xbf16>
    %c0_1 = arith.constant 0 : index
    %c0_2 = arith.constant 0 : index
    %1 = vector.load %arg1[%c0_1, %c0_2] : memref<256x128xbf16, #tpu.memory_space<vmem>>, vector<256x128xbf16>
    %cst = arith.constant dense<0.000000e+00> : vector<128x128xf32>
    %2 = tpu.matmul %0, %1, %cst {dimension_numbers = #tpu.dot_dimension_numbers<[1], [0], [0], [1], [0, 0, 1, 1], [], []>} : vector<128x256xbf16>, vector<256x128xbf16>, vector<128x128xf32> -> vector<128x128xf32>
    %c0_3 = arith.constant 0 : index
    %c0_4 = arith.constant 0 : index
    %3 = vector.load %arg2[%c0_3, %c0_4] : memref<1x128xf32, #tpu.memory_space<vmem>>, vector<1x128xf32>
    %4 = vector.broadcast %3 : vector<1x128xf32> to vector<128x128xf32>
    %5 = arith.addf %2, %4 : vector<128x128xf32>
    %cst_5 = arith.constant 0.000000e+00 : f32
    %6 = vector.broadcast %cst_5 : f32 to vector<128x128xf32>
    %7 = arith.maximumf %5, %6 : vector<128x128xf32>
    %c0_6 = arith.constant 0 : index
    %c0_7 = arith.constant 0 : index
    %8 = vector.load %arg3[%c0_6, %c0_7] : memref<288x128xbf16, #tpu.memory_space<vmem>>, vector<288x128xbf16>
    %9 = arith.truncf %7 : vector<128x128xf32> to vector<128x128xbf16>
    %cst_8 = arith.constant dense<0.000000e+00> : vector<288x128xf32>
    %10 = tpu.matmul %8, %9, %cst_8 {dimension_numbers = #tpu.dot_dimension_numbers<[1], [0], [0], [1], [0, 0, 1, 1], [], []>} : vector<288x128xbf16>, vector<128x128xbf16>, vector<288x128xf32> -> vector<288x128xf32>
    %11 = vector.extract_strided_slice %10 {offsets = [0, 0], sizes = [32, 128], strides = [1, 1]} : vector<288x128xf32> to vector<32x128xf32>
    %12 = vector.extract_strided_slice %10 {offsets = [32, 0], sizes = [32, 128], strides = [1, 1]} : vector<288x128xf32> to vector<32x128xf32>
    %13 = arith.maximumf %11, %12 : vector<32x128xf32>
    %14 = vector.extract_strided_slice %10 {offsets = [64, 0], sizes = [32, 128], strides = [1, 1]} : vector<288x128xf32> to vector<32x128xf32>
    %15 = arith.maximumf %13, %14 : vector<32x128xf32>
    %16 = vector.extract_strided_slice %10 {offsets = [96, 0], sizes = [32, 128], strides = [1, 1]} : vector<288x128xf32> to vector<32x128xf32>
    %17 = arith.maximumf %15, %16 : vector<32x128xf32>
    %18 = vector.extract_strided_slice %10 {offsets = [128, 0], sizes = [32, 128], strides = [1, 1]} : vector<288x128xf32> to vector<32x128xf32>
    %19 = arith.maximumf %17, %18 : vector<32x128xf32>
    %20 = vector.extract_strided_slice %10 {offsets = [160, 0], sizes = [32, 128], strides = [1, 1]} : vector<288x128xf32> to vector<32x128xf32>
    %21 = arith.maximumf %19, %20 : vector<32x128xf32>
    %22 = vector.extract_strided_slice %10 {offsets = [192, 0], sizes = [32, 128], strides = [1, 1]} : vector<288x128xf32> to vector<32x128xf32>
    %23 = arith.maximumf %21, %22 : vector<32x128xf32>
    %24 = vector.extract_strided_slice %10 {offsets = [224, 0], sizes = [32, 128], strides = [1, 1]} : vector<288x128xf32> to vector<32x128xf32>
    %25 = arith.maximumf %23, %24 : vector<32x128xf32>
    %26 = vector.extract_strided_slice %10 {offsets = [256, 0], sizes = [32, 128], strides = [1, 1]} : vector<288x128xf32> to vector<32x128xf32>
    %27 = arith.maximumf %25, %26 : vector<32x128xf32>
    %c0_9 = arith.constant 0 : index
    %c0_10 = arith.constant 0 : index
    %28 = vector.load %arg4[%c0_9, %c0_10] : memref<128x128xbf16, #tpu.memory_space<vmem>>, vector<128x128xbf16>
    %29 = arith.truncf %27 : vector<32x128xf32> to vector<32x128xbf16>
    %cst_11 = arith.constant dense<0.000000e+00> : vector<32x128xf32>
    %30 = tpu.matmul %29, %28, %cst_11 {dimension_numbers = #tpu.dot_dimension_numbers<[1], [0], [0], [1], [0, 0, 1, 1], [], []>} : vector<32x128xbf16>, vector<128x128xbf16>, vector<32x128xf32> -> vector<32x128xf32>
    %c0_12 = arith.constant 0 : index
    %c0_13 = arith.constant 0 : index
    %31 = vector.load %arg5[%c0_12, %c0_13] : memref<1x128xf32, #tpu.memory_space<vmem>>, vector<1x128xf32>
    %32 = vector.broadcast %31 : vector<1x128xf32> to vector<32x128xf32>
    %33 = arith.addf %30, %32 : vector<32x128xf32>
    %cst_14 = arith.constant 0.000000e+00 : f32
    %34 = vector.broadcast %cst_14 : f32 to vector<32x128xf32>
    %35 = arith.maximumf %33, %34 : vector<32x128xf32>
    %c0_15 = arith.constant 0 : index
    %c0_16 = arith.constant 0 : index
    %36 = vector.load %arg6[%c0_15, %c0_16] : memref<288x32xbf16, #tpu.memory_space<vmem>>, vector<288x32xbf16>
    %37 = arith.truncf %35 : vector<32x128xf32> to vector<32x128xbf16>
    %cst_17 = arith.constant dense<0.000000e+00> : vector<288x128xf32>
    %38 = tpu.matmul %36, %37, %cst_17 {dimension_numbers = #tpu.dot_dimension_numbers<[1], [0], [0], [1], [0, 0, 1, 1], [], []>} : vector<288x32xbf16>, vector<32x128xbf16>, vector<288x128xf32> -> vector<288x128xf32>
    %39 = vector.extract_strided_slice %38 {offsets = [0, 0], sizes = [32, 128], strides = [1, 1]} : vector<288x128xf32> to vector<32x128xf32>
    %c0_18 = arith.constant 0 : index
    %c0_19 = arith.constant 0 : index
    %40 = vector.load %arg7[%c0_18, %c0_19] : memref<1152x128xbf16, #tpu.memory_space<vmem>>, vector<128x128xbf16>
    %41 = arith.truncf %39 : vector<32x128xf32> to vector<32x128xbf16>
    %cst_20 = arith.constant dense<0.000000e+00> : vector<32x128xf32>
    %42 = tpu.matmul %41, %40, %cst_20 {dimension_numbers = #tpu.dot_dimension_numbers<[1], [0], [0], [1], [0, 0, 1, 1], [], []>} : vector<32x128xbf16>, vector<128x128xbf16>, vector<32x128xf32> -> vector<32x128xf32>
    %43 = vector.extract_strided_slice %38 {offsets = [32, 0], sizes = [32, 128], strides = [1, 1]} : vector<288x128xf32> to vector<32x128xf32>
    %c128 = arith.constant 128 : index
    %c0_21 = arith.constant 0 : index
    %44 = vector.load %arg7[%c128, %c0_21] : memref<1152x128xbf16, #tpu.memory_space<vmem>>, vector<128x128xbf16>
    %45 = arith.truncf %43 : vector<32x128xf32> to vector<32x128xbf16>
    %cst_22 = arith.constant dense<0.000000e+00> : vector<32x128xf32>
    %46 = tpu.matmul %45, %44, %cst_22 {dimension_numbers = #tpu.dot_dimension_numbers<[1], [0], [0], [1], [0, 0, 1, 1], [], []>} : vector<32x128xbf16>, vector<128x128xbf16>, vector<32x128xf32> -> vector<32x128xf32>
    %47 = arith.addf %42, %46 : vector<32x128xf32>
    %48 = vector.extract_strided_slice %38 {offsets = [64, 0], sizes = [32, 128], strides = [1, 1]} : vector<288x128xf32> to vector<32x128xf32>
    %c256 = arith.constant 256 : index
    %c0_23 = arith.constant 0 : index
    %49 = vector.load %arg7[%c256, %c0_23] : memref<1152x128xbf16, #tpu.memory_space<vmem>>, vector<128x128xbf16>
    %50 = arith.truncf %48 : vector<32x128xf32> to vector<32x128xbf16>
    %cst_24 = arith.constant dense<0.000000e+00> : vector<32x128xf32>
    %51 = tpu.matmul %50, %49, %cst_24 {dimension_numbers = #tpu.dot_dimension_numbers<[1], [0], [0], [1], [0, 0, 1, 1], [], []>} : vector<32x128xbf16>, vector<128x128xbf16>, vector<32x128xf32> -> vector<32x128xf32>
    %52 = arith.addf %47, %51 : vector<32x128xf32>
    %53 = vector.extract_strided_slice %38 {offsets = [96, 0], sizes = [32, 128], strides = [1, 1]} : vector<288x128xf32> to vector<32x128xf32>
    %c384 = arith.constant 384 : index
    %c0_25 = arith.constant 0 : index
    %54 = vector.load %arg7[%c384, %c0_25] : memref<1152x128xbf16, #tpu.memory_space<vmem>>, vector<128x128xbf16>
    %55 = arith.truncf %53 : vector<32x128xf32> to vector<32x128xbf16>
    %cst_26 = arith.constant dense<0.000000e+00> : vector<32x128xf32>
    %56 = tpu.matmul %55, %54, %cst_26 {dimension_numbers = #tpu.dot_dimension_numbers<[1], [0], [0], [1], [0, 0, 1, 1], [], []>} : vector<32x128xbf16>, vector<128x128xbf16>, vector<32x128xf32> -> vector<32x128xf32>
    %57 = arith.addf %52, %56 : vector<32x128xf32>
    %58 = vector.extract_strided_slice %38 {offsets = [128, 0], sizes = [32, 128], strides = [1, 1]} : vector<288x128xf32> to vector<32x128xf32>
    %c512 = arith.constant 512 : index
    %c0_27 = arith.constant 0 : index
    %59 = vector.load %arg7[%c512, %c0_27] : memref<1152x128xbf16, #tpu.memory_space<vmem>>, vector<128x128xbf16>
    %60 = arith.truncf %58 : vector<32x128xf32> to vector<32x128xbf16>
    %cst_28 = arith.constant dense<0.000000e+00> : vector<32x128xf32>
    %61 = tpu.matmul %60, %59, %cst_28 {dimension_numbers = #tpu.dot_dimension_numbers<[1], [0], [0], [1], [0, 0, 1, 1], [], []>} : vector<32x128xbf16>, vector<128x128xbf16>, vector<32x128xf32> -> vector<32x128xf32>
    %62 = arith.addf %57, %61 : vector<32x128xf32>
    %63 = vector.extract_strided_slice %38 {offsets = [160, 0], sizes = [32, 128], strides = [1, 1]} : vector<288x128xf32> to vector<32x128xf32>
    %c640 = arith.constant 640 : index
    %c0_29 = arith.constant 0 : index
    %64 = vector.load %arg7[%c640, %c0_29] : memref<1152x128xbf16, #tpu.memory_space<vmem>>, vector<128x128xbf16>
    %65 = arith.truncf %63 : vector<32x128xf32> to vector<32x128xbf16>
    %cst_30 = arith.constant dense<0.000000e+00> : vector<32x128xf32>
    %66 = tpu.matmul %65, %64, %cst_30 {dimension_numbers = #tpu.dot_dimension_numbers<[1], [0], [0], [1], [0, 0, 1, 1], [], []>} : vector<32x128xbf16>, vector<128x128xbf16>, vector<32x128xf32> -> vector<32x128xf32>
    %67 = arith.addf %62, %66 : vector<32x128xf32>
    %68 = vector.extract_strided_slice %38 {offsets = [192, 0], sizes = [32, 128], strides = [1, 1]} : vector<288x128xf32> to vector<32x128xf32>
    %c768 = arith.constant 768 : index
    %c0_31 = arith.constant 0 : index
    %69 = vector.load %arg7[%c768, %c0_31] : memref<1152x128xbf16, #tpu.memory_space<vmem>>, vector<128x128xbf16>
    %70 = arith.truncf %68 : vector<32x128xf32> to vector<32x128xbf16>
    %cst_32 = arith.constant dense<0.000000e+00> : vector<32x128xf32>
    %71 = tpu.matmul %70, %69, %cst_32 {dimension_numbers = #tpu.dot_dimension_numbers<[1], [0], [0], [1], [0, 0, 1, 1], [], []>} : vector<32x128xbf16>, vector<128x128xbf16>, vector<32x128xf32> -> vector<32x128xf32>
    %72 = arith.addf %67, %71 : vector<32x128xf32>
    %73 = vector.extract_strided_slice %38 {offsets = [224, 0], sizes = [32, 128], strides = [1, 1]} : vector<288x128xf32> to vector<32x128xf32>
    %c896 = arith.constant 896 : index
    %c0_33 = arith.constant 0 : index
    %74 = vector.load %arg7[%c896, %c0_33] : memref<1152x128xbf16, #tpu.memory_space<vmem>>, vector<128x128xbf16>
    %75 = arith.truncf %73 : vector<32x128xf32> to vector<32x128xbf16>
    %cst_34 = arith.constant dense<0.000000e+00> : vector<32x128xf32>
    %76 = tpu.matmul %75, %74, %cst_34 {dimension_numbers = #tpu.dot_dimension_numbers<[1], [0], [0], [1], [0, 0, 1, 1], [], []>} : vector<32x128xbf16>, vector<128x128xbf16>, vector<32x128xf32> -> vector<32x128xf32>
    %77 = arith.addf %72, %76 : vector<32x128xf32>
    %78 = vector.extract_strided_slice %38 {offsets = [256, 0], sizes = [32, 128], strides = [1, 1]} : vector<288x128xf32> to vector<32x128xf32>
    %c1024 = arith.constant 1024 : index
    %c0_35 = arith.constant 0 : index
    %79 = vector.load %arg7[%c1024, %c0_35] : memref<1152x128xbf16, #tpu.memory_space<vmem>>, vector<128x128xbf16>
    %80 = arith.truncf %78 : vector<32x128xf32> to vector<32x128xbf16>
    %cst_36 = arith.constant dense<0.000000e+00> : vector<32x128xf32>
    %81 = tpu.matmul %80, %79, %cst_36 {dimension_numbers = #tpu.dot_dimension_numbers<[1], [0], [0], [1], [0, 0, 1, 1], [], []>} : vector<32x128xbf16>, vector<128x128xbf16>, vector<32x128xf32> -> vector<32x128xf32>
    %82 = arith.addf %77, %81 : vector<32x128xf32>
    %c0_37 = arith.constant 0 : index
    %c0_38 = arith.constant 0 : index
    %83 = vector.load %arg8[%c0_37, %c0_38] : memref<1x128xf32, #tpu.memory_space<vmem>>, vector<1x128xf32>
    %84 = vector.broadcast %83 : vector<1x128xf32> to vector<32x128xf32>
    %85 = arith.addf %82, %84 : vector<32x128xf32>
    %cst_39 = arith.constant 0.000000e+00 : f32
    %86 = vector.broadcast %cst_39 : f32 to vector<32x128xf32>
    %87 = arith.maximumf %85, %86 : vector<32x128xf32>
    %c0_40 = arith.constant 0 : index
    %c0_41 = arith.constant 0 : index
    %88 = vector.load %arg9[%c0_40, %c0_41] : memref<128x128xbf16, #tpu.memory_space<vmem>>, vector<128x128xbf16>
    %89 = arith.truncf %87 : vector<32x128xf32> to vector<32x128xbf16>
    %cst_42 = arith.constant dense<0.000000e+00> : vector<32x128xf32>
    %90 = tpu.matmul %89, %88, %cst_42 {dimension_numbers = #tpu.dot_dimension_numbers<[1], [0], [0], [1], [0, 0, 1, 1], [], []>} : vector<32x128xbf16>, vector<128x128xbf16>, vector<32x128xf32> -> vector<32x128xf32>
    %c0_43 = arith.constant 0 : index
    %c0_44 = arith.constant 0 : index
    %91 = vector.load %arg10[%c0_43, %c0_44] : memref<1x128xf32, #tpu.memory_space<vmem>>, vector<1x128xf32>
    %92 = vector.broadcast %91 : vector<1x128xf32> to vector<32x128xf32>
    %93 = arith.addf %90, %92 : vector<32x128xf32>
    %c0_45 = arith.constant 0 : index
    %c0_46 = arith.constant 0 : index
    %94 = vector.load %arg11[%c0_45, %c0_46] : memref<128x128xbf16, #tpu.memory_space<vmem>>, vector<128x128xbf16>
    %95 = arith.truncf %27 : vector<32x128xf32> to vector<32x128xbf16>
    %cst_47 = arith.constant dense<0.000000e+00> : vector<32x128xf32>
    %96 = tpu.matmul %95, %94, %cst_47 {dimension_numbers = #tpu.dot_dimension_numbers<[1], [0], [0], [1], [0, 0, 1, 1], [], []>} : vector<32x128xbf16>, vector<128x128xbf16>, vector<32x128xf32> -> vector<32x128xf32>
    %c0_48 = arith.constant 0 : index
    %c0_49 = arith.constant 0 : index
    %97 = vector.load %arg12[%c0_48, %c0_49] : memref<1x128xf32, #tpu.memory_space<vmem>>, vector<1x128xf32>
    %98 = vector.broadcast %97 : vector<1x128xf32> to vector<32x128xf32>
    %99 = arith.addf %96, %98 : vector<32x128xf32>
    %100 = arith.addf %93, %99 : vector<32x128xf32>
    %cst_50 = arith.constant 0.000000e+00 : f32
    %101 = vector.broadcast %cst_50 : f32 to vector<32x128xf32>
    %102 = arith.maximumf %100, %101 : vector<32x128xf32>
    %c0_51 = arith.constant 0 : index
    %c0_52 = arith.constant 0 : index
    %103 = vector.load %arg13[%c0_51, %c0_52] : memref<128x128xbf16, #tpu.memory_space<vmem>>, vector<128x128xbf16>
    %104 = arith.truncf %102 : vector<32x128xf32> to vector<32x128xbf16>
    %cst_53 = arith.constant dense<0.000000e+00> : vector<32x128xf32>
    %105 = tpu.matmul %104, %103, %cst_53 {dimension_numbers = #tpu.dot_dimension_numbers<[1], [0], [0], [1], [0, 0, 1, 1], [], []>} : vector<32x128xbf16>, vector<128x128xbf16>, vector<32x128xf32> -> vector<32x128xf32>
    %c0_54 = arith.constant 0 : index
    %c0_55 = arith.constant 0 : index
    %106 = vector.load %arg14[%c0_54, %c0_55] : memref<1x128xf32, #tpu.memory_space<vmem>>, vector<1x128xf32>
    %107 = vector.broadcast %106 : vector<1x128xf32> to vector<32x128xf32>
    %108 = arith.addf %105, %107 : vector<32x128xf32>
    %cst_56 = arith.constant 0.000000e+00 : f32
    %109 = vector.broadcast %cst_56 : f32 to vector<32x128xf32>
    %110 = arith.maximumf %108, %109 : vector<32x128xf32>
    %c0_57 = arith.constant 0 : index
    %c0_58 = arith.constant 0 : index
    %111 = vector.load %arg15[%c0_57, %c0_58] : memref<72x32xbf16, #tpu.memory_space<vmem>>, vector<72x32xbf16>
    %112 = arith.truncf %110 : vector<32x128xf32> to vector<32x128xbf16>
    %cst_59 = arith.constant dense<0.000000e+00> : vector<72x128xf32>
    %113 = tpu.matmul %111, %112, %cst_59 {dimension_numbers = #tpu.dot_dimension_numbers<[1], [0], [0], [1], [0, 0, 1, 1], [], []>} : vector<72x32xbf16>, vector<32x128xbf16>, vector<72x128xf32> -> vector<72x128xf32>
    %114 = vector.extract_strided_slice %113 {offsets = [0, 0], sizes = [8, 128], strides = [1, 1]} : vector<72x128xf32> to vector<8x128xf32>
    %c0_60 = arith.constant 0 : index
    %c0_61 = arith.constant 0 : index
    %115 = vector.load %arg16[%c0_60, %c0_61] : memref<1152x128xbf16, #tpu.memory_space<vmem>>, vector<128x128xbf16>
    %116 = arith.truncf %114 : vector<8x128xf32> to vector<8x128xbf16>
    %cst_62 = arith.constant dense<0.000000e+00> : vector<8x128xf32>
    %117 = tpu.matmul %116, %115, %cst_62 {dimension_numbers = #tpu.dot_dimension_numbers<[1], [0], [0], [1], [0, 0, 1, 1], [], []>} : vector<8x128xbf16>, vector<128x128xbf16>, vector<8x128xf32> -> vector<8x128xf32>
    %118 = vector.extract_strided_slice %113 {offsets = [8, 0], sizes = [8, 128], strides = [1, 1]} : vector<72x128xf32> to vector<8x128xf32>
    %c128_63 = arith.constant 128 : index
    %c0_64 = arith.constant 0 : index
    %119 = vector.load %arg16[%c128_63, %c0_64] : memref<1152x128xbf16, #tpu.memory_space<vmem>>, vector<128x128xbf16>
    %120 = arith.truncf %118 : vector<8x128xf32> to vector<8x128xbf16>
    %cst_65 = arith.constant dense<0.000000e+00> : vector<8x128xf32>
    %121 = tpu.matmul %120, %119, %cst_65 {dimension_numbers = #tpu.dot_dimension_numbers<[1], [0], [0], [1], [0, 0, 1, 1], [], []>} : vector<8x128xbf16>, vector<128x128xbf16>, vector<8x128xf32> -> vector<8x128xf32>
    %122 = arith.addf %117, %121 : vector<8x128xf32>
    %123 = vector.extract_strided_slice %113 {offsets = [16, 0], sizes = [8, 128], strides = [1, 1]} : vector<72x128xf32> to vector<8x128xf32>
    %c256_66 = arith.constant 256 : index
    %c0_67 = arith.constant 0 : index
    %124 = vector.load %arg16[%c256_66, %c0_67] : memref<1152x128xbf16, #tpu.memory_space<vmem>>, vector<128x128xbf16>
    %125 = arith.truncf %123 : vector<8x128xf32> to vector<8x128xbf16>
    %cst_68 = arith.constant dense<0.000000e+00> : vector<8x128xf32>
    %126 = tpu.matmul %125, %124, %cst_68 {dimension_numbers = #tpu.dot_dimension_numbers<[1], [0], [0], [1], [0, 0, 1, 1], [], []>} : vector<8x128xbf16>, vector<128x128xbf16>, vector<8x128xf32> -> vector<8x128xf32>
    %127 = arith.addf %122, %126 : vector<8x128xf32>
    %128 = vector.extract_strided_slice %113 {offsets = [24, 0], sizes = [8, 128], strides = [1, 1]} : vector<72x128xf32> to vector<8x128xf32>
    %c384_69 = arith.constant 384 : index
    %c0_70 = arith.constant 0 : index
    %129 = vector.load %arg16[%c384_69, %c0_70] : memref<1152x128xbf16, #tpu.memory_space<vmem>>, vector<128x128xbf16>
    %130 = arith.truncf %128 : vector<8x128xf32> to vector<8x128xbf16>
    %cst_71 = arith.constant dense<0.000000e+00> : vector<8x128xf32>
    %131 = tpu.matmul %130, %129, %cst_71 {dimension_numbers = #tpu.dot_dimension_numbers<[1], [0], [0], [1], [0, 0, 1, 1], [], []>} : vector<8x128xbf16>, vector<128x128xbf16>, vector<8x128xf32> -> vector<8x128xf32>
    %132 = arith.addf %127, %131 : vector<8x128xf32>
    %133 = vector.extract_strided_slice %113 {offsets = [32, 0], sizes = [8, 128], strides = [1, 1]} : vector<72x128xf32> to vector<8x128xf32>
    %c512_72 = arith.constant 512 : index
    %c0_73 = arith.constant 0 : index
    %134 = vector.load %arg16[%c512_72, %c0_73] : memref<1152x128xbf16, #tpu.memory_space<vmem>>, vector<128x128xbf16>
    %135 = arith.truncf %133 : vector<8x128xf32> to vector<8x128xbf16>
    %cst_74 = arith.constant dense<0.000000e+00> : vector<8x128xf32>
    %136 = tpu.matmul %135, %134, %cst_74 {dimension_numbers = #tpu.dot_dimension_numbers<[1], [0], [0], [1], [0, 0, 1, 1], [], []>} : vector<8x128xbf16>, vector<128x128xbf16>, vector<8x128xf32> -> vector<8x128xf32>
    %137 = arith.addf %132, %136 : vector<8x128xf32>
    %138 = vector.extract_strided_slice %113 {offsets = [40, 0], sizes = [8, 128], strides = [1, 1]} : vector<72x128xf32> to vector<8x128xf32>
    %c640_75 = arith.constant 640 : index
    %c0_76 = arith.constant 0 : index
    %139 = vector.load %arg16[%c640_75, %c0_76] : memref<1152x128xbf16, #tpu.memory_space<vmem>>, vector<128x128xbf16>
    %140 = arith.truncf %138 : vector<8x128xf32> to vector<8x128xbf16>
    %cst_77 = arith.constant dense<0.000000e+00> : vector<8x128xf32>
    %141 = tpu.matmul %140, %139, %cst_77 {dimension_numbers = #tpu.dot_dimension_numbers<[1], [0], [0], [1], [0, 0, 1, 1], [], []>} : vector<8x128xbf16>, vector<128x128xbf16>, vector<8x128xf32> -> vector<8x128xf32>
    %142 = arith.addf %137, %141 : vector<8x128xf32>
    %143 = vector.extract_strided_slice %113 {offsets = [48, 0], sizes = [8, 128], strides = [1, 1]} : vector<72x128xf32> to vector<8x128xf32>
    %c768_78 = arith.constant 768 : index
    %c0_79 = arith.constant 0 : index
    %144 = vector.load %arg16[%c768_78, %c0_79] : memref<1152x128xbf16, #tpu.memory_space<vmem>>, vector<128x128xbf16>
    %145 = arith.truncf %143 : vector<8x128xf32> to vector<8x128xbf16>
    %cst_80 = arith.constant dense<0.000000e+00> : vector<8x128xf32>
    %146 = tpu.matmul %145, %144, %cst_80 {dimension_numbers = #tpu.dot_dimension_numbers<[1], [0], [0], [1], [0, 0, 1, 1], [], []>} : vector<8x128xbf16>, vector<128x128xbf16>, vector<8x128xf32> -> vector<8x128xf32>
    %147 = arith.addf %142, %146 : vector<8x128xf32>
    %148 = vector.extract_strided_slice %113 {offsets = [56, 0], sizes = [8, 128], strides = [1, 1]} : vector<72x128xf32> to vector<8x128xf32>
    %c896_81 = arith.constant 896 : index
    %c0_82 = arith.constant 0 : index
    %149 = vector.load %arg16[%c896_81, %c0_82] : memref<1152x128xbf16, #tpu.memory_space<vmem>>, vector<128x128xbf16>
    %150 = arith.truncf %148 : vector<8x128xf32> to vector<8x128xbf16>
    %cst_83 = arith.constant dense<0.000000e+00> : vector<8x128xf32>
    %151 = tpu.matmul %150, %149, %cst_83 {dimension_numbers = #tpu.dot_dimension_numbers<[1], [0], [0], [1], [0, 0, 1, 1], [], []>} : vector<8x128xbf16>, vector<128x128xbf16>, vector<8x128xf32> -> vector<8x128xf32>
    %152 = arith.addf %147, %151 : vector<8x128xf32>
    %153 = vector.extract_strided_slice %113 {offsets = [64, 0], sizes = [8, 128], strides = [1, 1]} : vector<72x128xf32> to vector<8x128xf32>
    %c1024_84 = arith.constant 1024 : index
    %c0_85 = arith.constant 0 : index
    %154 = vector.load %arg16[%c1024_84, %c0_85] : memref<1152x128xbf16, #tpu.memory_space<vmem>>, vector<128x128xbf16>
    %155 = arith.truncf %153 : vector<8x128xf32> to vector<8x128xbf16>
    %cst_86 = arith.constant dense<0.000000e+00> : vector<8x128xf32>
    %156 = tpu.matmul %155, %154, %cst_86 {dimension_numbers = #tpu.dot_dimension_numbers<[1], [0], [0], [1], [0, 0, 1, 1], [], []>} : vector<8x128xbf16>, vector<128x128xbf16>, vector<8x128xf32> -> vector<8x128xf32>
    %157 = arith.addf %152, %156 : vector<8x128xf32>
    %c0_87 = arith.constant 0 : index
    %c0_88 = arith.constant 0 : index
    %158 = vector.load %arg17[%c0_87, %c0_88] : memref<1x128xf32, #tpu.memory_space<vmem>>, vector<1x128xf32>
    %159 = vector.broadcast %158 : vector<1x128xf32> to vector<8x128xf32>
    %160 = arith.addf %157, %159 : vector<8x128xf32>
    %cst_89 = arith.constant 0.000000e+00 : f32
    %161 = vector.broadcast %cst_89 : f32 to vector<8x128xf32>
    %162 = arith.maximumf %160, %161 : vector<8x128xf32>
    %c0_90 = arith.constant 0 : index
    %c0_91 = arith.constant 0 : index
    %163 = vector.load %arg18[%c0_90, %c0_91] : memref<128x128xbf16, #tpu.memory_space<vmem>>, vector<128x128xbf16>
    %164 = arith.truncf %162 : vector<8x128xf32> to vector<8x128xbf16>
    %cst_92 = arith.constant dense<0.000000e+00> : vector<8x128xf32>
    %165 = tpu.matmul %164, %163, %cst_92 {dimension_numbers = #tpu.dot_dimension_numbers<[1], [0], [0], [1], [0, 0, 1, 1], [], []>} : vector<8x128xbf16>, vector<128x128xbf16>, vector<8x128xf32> -> vector<8x128xf32>
    %c0_93 = arith.constant 0 : index
    %c0_94 = arith.constant 0 : index
    %166 = vector.load %arg19[%c0_93, %c0_94] : memref<1x128xf32, #tpu.memory_space<vmem>>, vector<1x128xf32>
    %167 = vector.broadcast %166 : vector<1x128xf32> to vector<8x128xf32>
    %168 = arith.addf %165, %167 : vector<8x128xf32>
    %c0_95 = arith.constant 0 : index
    %c0_96 = arith.constant 0 : index
    %169 = vector.load %arg22[%c0_95, %c0_96] : memref<8x32xbf16, #tpu.memory_space<vmem>>, vector<8x32xbf16>
    %170 = arith.truncf %102 : vector<32x128xf32> to vector<32x128xbf16>
    %cst_97 = arith.constant dense<0.000000e+00> : vector<8x128xf32>
    %171 = tpu.matmul %169, %170, %cst_97 {dimension_numbers = #tpu.dot_dimension_numbers<[1], [0], [0], [1], [0, 0, 1, 1], [], []>} : vector<8x32xbf16>, vector<32x128xbf16>, vector<8x128xf32> -> vector<8x128xf32>
    %c0_98 = arith.constant 0 : index
    %c0_99 = arith.constant 0 : index
    %172 = vector.load %arg20[%c0_98, %c0_99] : memref<128x128xbf16, #tpu.memory_space<vmem>>, vector<128x128xbf16>
    %173 = arith.truncf %171 : vector<8x128xf32> to vector<8x128xbf16>
    %cst_100 = arith.constant dense<0.000000e+00> : vector<8x128xf32>
    %174 = tpu.matmul %173, %172, %cst_100 {dimension_numbers = #tpu.dot_dimension_numbers<[1], [0], [0], [1], [0, 0, 1, 1], [], []>} : vector<8x128xbf16>, vector<128x128xbf16>, vector<8x128xf32> -> vector<8x128xf32>
    %c0_101 = arith.constant 0 : index
    %c0_102 = arith.constant 0 : index
    %175 = vector.load %arg21[%c0_101, %c0_102] : memref<1x128xf32, #tpu.memory_space<vmem>>, vector<1x128xf32>
    %176 = vector.broadcast %175 : vector<1x128xf32> to vector<8x128xf32>
    %177 = arith.addf %174, %176 : vector<8x128xf32>
    %178 = arith.addf %168, %177 : vector<8x128xf32>
    %cst_103 = arith.constant 0.000000e+00 : f32
    %179 = vector.broadcast %cst_103 : f32 to vector<8x128xf32>
    %180 = arith.maximumf %178, %179 : vector<8x128xf32>
    %c0_104 = arith.constant 0 : index
    %c0_105 = arith.constant 0 : index
    %181 = vector.load %arg23[%c0_104, %c0_105] : memref<2x8xf32, #tpu.memory_space<vmem>>, vector<2x8xf32>
    %cst_106 = arith.constant dense<0.000000e+00> : vector<2x128xf32>
    %182 = tpu.matmul %181, %180, %cst_106 {dimension_numbers = #tpu.dot_dimension_numbers<[1], [0], [0], [1], [0, 0, 1, 1], [], []>} : vector<2x8xf32>, vector<8x128xf32>, vector<2x128xf32> -> vector<2x128xf32>
    %c0_107 = arith.constant 0 : index
    %c0_108 = arith.constant 0 : index
    %183 = vector.load %arg24[%c0_107, %c0_108] : memref<2x128xf32, #tpu.memory_space<vmem>>, vector<2x128xf32>
    tpu.vector_store %arg24[%c0_107, %c0_108], %182 {strides = array<i32>} : memref<2x128xf32, #tpu.memory_space<vmem>>, vector<2x128xf32>,
    return
  }
}

</mosaic_0001>

<bundles_post_ra>
// kernel: embedding_net_forward.1
= control target key start
LH: loop header
LB: loop body
LE: loop exit
PB: predicated region body
PF: predicated region fallthrough
CT: control target
= control target key end

     0   :  { %s7071_s0 = inlined_call_operand.vmem [shape: bf16[128,256], index: 0, kind: input, shape index: {}]   ;;  %s7072_s1 = inlined_call_operand.vmem [shape: bf16[256,128], index: 1, kind: input, shape index: {}]   ;;  %s7073_s2 = inlined_call_operand.vmem [shape: f32[1,128], index: 2, kind: input, shape index: {}]   ;;  %s7074_s3 = inlined_call_operand.vmem [shape: bf16[288,128], index: 3, kind: input, shape index: {}]   ;;  %s7075_s4 = inlined_call_operand.vmem [shape: bf16[128,128], index: 4, kind: input, shape index: {}]   ;;  %s7076_s5 = inlined_call_operand.vmem [shape: f32[1,128], index: 5, kind: input, shape index: {}]   ;;  %s7077_s6 = inlined_call_operand.vmem [shape: bf16[288,32], index: 6, kind: input, shape index: {}]   ;;  %s7078_s7 = inlined_call_operand.vmem [shape: bf16[1152,128], index: 7, kind: input, shape index: {}]   ;;  %s7079_s8 = inlined_call_operand.vmem [shape: f32[1,128], index: 8, kind: input, shape index: {}]   ;;  %s7080_s9 = inlined_call_operand.vmem [shape: bf16[128,128], index: 9, kind: input, shape index: {}]   ;;  %s7081_s10 = inlined_call_operand.vmem [shape: f32[1,128], index: 10, kind: input, shape index: {}]   ;;  %s7082_s11 = inlined_call_operand.vmem [shape: bf16[128,128], index: 11, kind: input, shape index: {}]   ;;  %s7083_s12 = inlined_call_operand.vmem [shape: f32[1,128], index: 12, kind: input, shape index: {}]   ;;  %s7084_s13 = inlined_call_operand.vmem [shape: bf16[128,128], index: 13, kind: input, shape index: {}]   ;;  %s7085_s14 = inlined_call_operand.vmem [shape: f32[1,128], index: 14, kind: input, shape index: {}]   ;;  %s7086_s15 = inlined_call_operand.vmem [shape: bf16[72,32], index: 15, kind: input, shape index: {}]   ;;  %s7087_s16 = inlined_call_operand.vmem [shape: bf16[1152,128], index: 16, kind: input, shape index: {}]   ;;  %s7088_s17 = inlined_call_operand.vmem [shape: f32[1,128], index: 17, kind: input, shape index: {}]   ;;  %s7089_s18 = inlined_call_operand.vmem [shape: bf16[128,128], index: 18, kind: input, shape index: {}]   ;;  %s7090_s19 = inlined_call_operand.vmem [shape: f32[1,128], index: 19, kind: input, shape index: {}]   ;;  %s7091_s20 = inlined_call_operand.vmem [shape: bf16[128,128], index: 20, kind: input, shape index: {}]   ;;  %s7092_s21 = inlined_call_operand.vmem [shape: f32[1,128], index: 21, kind: input, shape index: {}]   ;;  %s7093_s22 = inlined_call_operand.vmem [shape: bf16[8,32], index: 22, kind: input, shape index: {}]   ;;  %s7094_s23 = inlined_call_operand.vmem [shape: f32[2,8], index: 23, kind: input, shape index: {}]   ;;  %s7095_s24 = inlined_call_operand.hbm [shape: f32[2,128], index: 24, kind: output, shape index: {}]  }
   0x1   :  { %7102 = sst [smem:[#allocation5_spill]] %s7071_s0 }
   0x2   :  { %7103 = sst [smem:[#allocation6_spill]] %s7072_s1 }
   0x3   :  { %7104 = sst [smem:[#allocation7_spill]] %s7073_s2 }
   0x4   :  { %7105 = sst [smem:[#allocation8_spill]] %s7074_s3 }
   0x5   :  { %7106 = sst [smem:[#allocation9_spill]] %s7075_s4 }
   0x6   :  { %7107 = sst [smem:[#allocation10_spill]] %s7076_s5 }
   0x7   :  { %7108 = sst [smem:[#allocation11_spill]] %s7077_s6 }
   0x8   :  { %7109 = sst [smem:[#allocation12_spill]] %s7078_s7 }
   0x9   :  { %7110 = sst [smem:[#allocation13_spill]] %s7079_s8 }
   0xa   :  { %s7111_s27 = sld [smem:[#allocation6_spill]]  ;;  %s7112_s25 = sld [smem:[#allocation5_spill]] }
  0x10   :  { %v5478_v0 = vld [vmem:[%s7111_s27 + $0x40] sm:$0xff]   ;;  %v5480_v2 = vld [vmem:[%s7111_s27 + $0x48] sm:$0xff]   ;;  %v5482_v4 = vld [vmem:[%s7111_s27 + $0x50] sm:$0xff]  }
  0x11   :  { %v5479_v1 = vld [vmem:[%s7111_s27] sm:$0xff]   ;;  %4465 = vmatprep.subr.bf16.mxu0 %v5478_v0  ;;  %v5481_v3 = vld [vmem:[%s7111_s27 + $0x8] sm:$0xff]   ;;  %v5483_v5 = vld [vmem:[%s7111_s27 + $0x10] sm:$0xff]  }
  0x12   :  { %4466 = vmatpush3.bf16.msra.mxu0 %v5479_v1  ;;  %v5484_v6 = vld [vmem:[%s7111_s27 + $0x58] sm:$0xff]   ;;  %v5486_v8 = vld [vmem:[%s7111_s27 + $0x60] sm:$0xff]   ;;  %v5488_v10 = vld [vmem:[%s7111_s27 + $0x68] sm:$0xff]  }
  0x13   :  { %4467 = vmatprep.subr.bf16.mxu0 %v5480_v2  ;;  %v5485_v7 = vld [vmem:[%s7111_s27 + $0x18] sm:$0xff]   ;;  %v5487_v9 = vld [vmem:[%s7111_s27 + $0x20] sm:$0xff]   ;;  %v5489_v12 = vld [vmem:[%s7111_s27 + $0x28] sm:$0xff]  }
  0x14   :  { %v5496_v11 = vld [vmem:[%s7112_s25 + $0x4] ss:$8 sps:$4 sm:$0xff]   ;;  %v5490_v13 = vld [vmem:[%s7111_s27 + $0x70] sm:$0xff]   ;;  %v5492_v15 = vld [vmem:[%s7111_s27 + $0x78] sm:$0xff]  }
  0x15   :  { %342 = vmatprep.mubr.bf16.mxu0 %v5496_v11  ;;  %v5491_v14 = vld [vmem:[%s7111_s27 + $0x30] sm:$0xff]   ;;  %v5493_v16 = vld [vmem:[%s7111_s27 + $0x38] sm:$0xff]   ;;  %v5494_v17 = vld [vmem:[%s7112_s25] ss:$8 sps:$4 sm:$0xff]  }
  0x16   :  { %4468 = vmatpush3.bf16.msra.mxu0 %v5481_v3  ;;  %v5497_v18 = vld [vmem:[%s7112_s25 + $0x14] ss:$8 sps:$4 sm:$0xff]   ;;  %v5499_v19 = vld [vmem:[%s7112_s25 + $0x10] ss:$8 sps:$4 sm:$0xff]   ;;  %v5500_v20 = vld [vmem:[%s7112_s25 + $0x24] ss:$8 sps:$4 sm:$0xff]  }
  0x17   :  { %4469 = vmatprep.subr.bf16.mxu0 %v5482_v4  ;;  %v5502_v21 = vld [vmem:[%s7112_s25 + $0x20] ss:$8 sps:$4 sm:$0xff]   ;;  %v5503_v22 = vld [vmem:[%s7112_s25 + $0x34] ss:$8 sps:$4 sm:$0xff]   ;;  %v5505_v23 = vld [vmem:[%s7112_s25 + $0x30] ss:$8 sps:$4 sm:$0xff]  }
  0x18   :  { %v5506_v24 = vld [vmem:[%s7112_s25 + $0x44] ss:$8 sps:$4 sm:$0xff]   ;;  %v5508_v25 = vld [vmem:[%s7112_s25 + $0x40] ss:$8 sps:$4 sm:$0xff]   ;;  %v5509_v26 = vld [vmem:[%s7112_s25 + $0x54] ss:$8 sps:$4 sm:$0xff]  }
  0x19   :  { %v5511_v27 = vld [vmem:[%s7112_s25 + $0x50] ss:$8 sps:$4 sm:$0xff]   ;;  %v5512_v28 = vld [vmem:[%s7112_s25 + $0x64] ss:$8 sps:$4 sm:$0xff]   ;;  %v5514_v29 = vld [vmem:[%s7112_s25 + $0x60] ss:$8 sps:$4 sm:$0xff]  }
  0x1a   :  { %4470 = vmatpush3.bf16.msra.mxu0 %v5483_v5  ;;  %v5515_v30 = vld [vmem:[%s7112_s25 + $0x74] ss:$8 sps:$4 sm:$0xff]   ;;  %v5517_v31 = vld [vmem:[%s7112_s25 + $0x70] ss:$8 sps:$4 sm:$0xff]  }
  0x1b   :  { %4471 = vmatprep.subr.bf16.mxu0 %v5484_v6 }
  0x1e   :  { %4472 = vmatpush3.bf16.msra.mxu0 %v5485_v7 }
  0x1f   :  { %4473 = vmatprep.subr.bf16.mxu0 %v5486_v8 }
  0x22   :  { %4474 = vmatpush3.bf16.msra.mxu0 %v5487_v9 }
  0x23   :  { %4475 = vmatprep.subr.bf16.mxu0 %v5488_v10 }
  0x26   :  { %4476 = vmatpush3.bf16.msra.mxu0 %v5489_v12 }
  0x27   :  { %4477 = vmatprep.subr.bf16.mxu0 %v5490_v13 }
  0x2a   :  { %4478 = vmatpush3.bf16.msra.mxu0 %v5491_v14 }
  0x2b   :  { %4479 = vmatprep.subr.bf16.mxu0 %v5492_v15 }
  0x2e   :  { %4480 = vmatpush3.bf16.msra.mxu0 %v5493_v16 }
  0x31   :  { %343 = vmatmul.mubr.bf16.vlgmr.msra.gmra.mrb[0].mxu0 %v5494_v17 }
  0x32   :  { %350 = vmatprep.mubr.bf16.mxu0 %v5497_v18 }
  0x39   :  { %351 = vmatmul.mubr.bf16.gmra.mrb[4].mxu0 %v5499_v19 }
  0x3a   :  { %358 = vmatprep.mubr.bf16.mxu0 %v5500_v20 }
  0x41   :  { %359 = vmatmul.mubr.bf16.gmra.mrb[8].mxu0 %v5502_v21 }
  0x42   :  { %366 = vmatprep.mubr.bf16.mxu0 %v5503_v22 }
  0x49   :  { %367 = vmatmul.mubr.bf16.gmra.mrb[12].mxu0 %v5505_v23 }
  0x4a   :  { %374 = vmatprep.mubr.bf16.mxu0 %v5506_v24 }
  0x51   :  { %375 = vmatmul.mubr.bf16.gmra.mrb[16].mxu0 %v5508_v25 }
  0x52   :  { %382 = vmatprep.mubr.bf16.mxu0 %v5509_v26 }
  0x59   :  { %383 = vmatmul.mubr.bf16.gmra.mrb[20].mxu0 %v5511_v27 }
  0x5a   :  { %390 = vmatprep.mubr.bf16.mxu0 %v5512_v28 }
  0x61   :  { %391 = vmatmul.mubr.bf16.gmra.mrb[24].mxu0 %v5514_v29 }
  0x62   :  { %398 = vmatprep.mubr.bf16.mxu0 %v5515_v30 }
  0x69   :  { %399 = vmatmul.mubr.bf16.gmra.mrb[28].mxu0 %v5517_v31 }
  0x6a   :  { %29 = vsyncpa [#allocation3], 0  ;;  %s7113_s4 = sld [smem:[#allocation8_spill]]  ;;  %s7114_s26 = sld [smem:[#allocation7_spill]]  ;;  %vm1038_vm0 = vcmask 261120   ;;  %vm5776_vm1 = vmmov 0  }
  0x6b   :  { %s7115_s30 = sld [smem:[#allocation9_spill]]  ;;  %s7116_s8 = sld [smem:[#allocation11_spill]]  ;;  %vm4077_vm2 = vcmask 64512  }
  0x6c   :  { %s7118_s5 = sld [smem:[#allocation10_spill]]  ;;  %s7119_s2 = sld [smem:[#allocation13_spill]] }
  0x6d   :  { %s5777_s28 = smov [#allocation2]  }
  0x70   :  { %v5518_v32 = vld [vmem:[%s7113_s4] sm:$0xff]  }
  0x71   :  { %4832 = vmatprep.mubr.bf16.mxu1 %v5518_v32  ;;  %v6005_v34 = vld [vmem:[%s7114_s26] ss:$0 sm:$0xff] }
 0x104   :  { %v4481_v33 = vpop.f32.mrb[0].mxu0 }
 0x105   :  { %v4482_v35 = vpop.f32.mrb[1].mxu0 }
 0x106   :  { %v4483_v36 = vadd.f32 %v4482_v35, %v4481_v33  ;;  %v4484_v37 = vpop.f32.mrb[2].mxu0 }
 0x107   :  { %v4485_v38 = vpop.f32.mrb[3].mxu0 }
 0x108   :  { %v345_v39 = vadd.f32 %v4483_v36, %v6005_v34  ;;  %v4486_v40 = vadd.f32 %v4485_v38, %v4484_v37 }
 0x10a   :  { %v348_v41 = vadd.f32 %v4486_v40, %v6005_v34  ;;  %v407_v42 = vmax.f32 %v345_v39, 0.0 }
 0x10c   :  { %v408_v43 = vmax.f32 %v348_v41, 0.0  ;;  %v4487_v44 = vpop.f32.mrb[4].mxu0 }
 0x10d   :  { %v4488_v45 = vpop.f32.mrb[5].mxu0 }
 0x10e   :  { %v4489_v46 = vadd.f32 %v4488_v45, %v4487_v44  ;;  %v4490_v47 = vpop.f32.mrb[6].mxu0  ;;  %v459_v48 = vpack.c.bf16 %v408_v43, %v407_v42 }
 0x10f   :  { %v4491_v49 = vpop.f32.mrb[7].mxu0 }
 0x110   :  { %v353_v50 = vadd.f32 %v4489_v46, %v6005_v34  ;;  %v4492_v51 = vadd.f32 %v4491_v49, %v4490_v47  ;;  %4816 = vmatprep.subr.bf16.mxu1 %v459_v48 }
 0x111   :  { %4817 = vmatpush3.bf16.msra.mxu1 %v459_v48 }
 0x112   :  { %v356_v52 = vadd.f32 %v4492_v51, %v6005_v34  ;;  %v409_v53 = vmax.f32 %v353_v50, 0.0 }
 0x114   :  { %v410_v54 = vmax.f32 %v356_v52, 0.0  ;;  %v4493_v55 = vpop.f32.mrb[8].mxu0 }
 0x115   :  { %v4494_v56 = vpop.f32.mrb[9].mxu0 }
 0x116   :  { %v4495_v57 = vadd.f32 %v4494_v56, %v4493_v55  ;;  %v4496_v58 = vpop.f32.mrb[10].mxu0  ;;  %v460_v59 = vpack.c.bf16 %v410_v54, %v409_v53 }
 0x117   :  { %v4497_v60 = vpop.f32.mrb[11].mxu0 }
 0x118   :  { %v361_v61 = vadd.f32 %v4495_v57, %v6005_v34  ;;  %v4498_v62 = vadd.f32 %v4497_v60, %v4496_v58  ;;  %4818 = vmatprep.subr.bf16.mxu1 %v460_v59  ;;  %v5520_v60 = vld [vmem:[%s7113_s4 + $0x10] sm:$0xff]  }
 0x119   :  { %4819 = vmatpush3.bf16.msra.mxu1 %v460_v59  ;;  %v5519_v59 = vld [vmem:[%s7113_s4 + $0x8] sm:$0xff]  }
 0x11a   :  { %v364_v63 = vadd.f32 %v4498_v62, %v6005_v34  ;;  %v411_v0 = vmax.f32 %v361_v61, 0.0  ;;  %v5521_v61 = vld [vmem:[%s7113_s4 + $0x18] sm:$0xff]   ;;  %v5523_v62 = vld [vmem:[%s7113_s4 + $0x28] sm:$0xff]  }
 0x11c   :  { %v412_v1 = vmax.f32 %v364_v63, 0.0  ;;  %v4499_v2 = vpop.f32.mrb[12].mxu0  ;;  %v5524_v63 = vld [vmem:[%s7113_s4 + $0x30] sm:$0xff]  }
 0x11d   :  { %v4500_v3 = vpop.f32.mrb[13].mxu0 }
 0x11e   :  { %v4501_v4 = vadd.f32 %v4500_v3, %v4499_v2  ;;  %v4502_v5 = vpop.f32.mrb[14].mxu0  ;;  %v461_v6 = vpack.c.bf16 %v412_v1, %v411_v0  ;;  %v5525_v0 = vld [vmem:[%s7113_s4 + $0x38] sm:$0xff]   ;;  %v5526_v1 = vld [vmem:[%s7113_s4 + $0x40] sm:$0xff]   ;;  %v5527_v2 = vld [vmem:[%s7113_s4 + $0x48] sm:$0xff]  }
 0x11f   :  { %v4503_v7 = vpop.f32.mrb[15].mxu0  ;;  %v5528_v3 = vld [vmem:[%s7113_s4 + $0x50] sm:$0xff]  }
 0x120   :  { %v369_v8 = vadd.f32 %v4501_v4, %v6005_v34  ;;  %v4504_v9 = vadd.f32 %v4503_v7, %v4502_v5  ;;  %4820 = vmatprep.subr.bf16.mxu1 %v461_v6  ;;  %v5529_v4 = vld [vmem:[%s7113_s4 + $0x58] sm:$0xff]   ;;  %v5530_v5 = vld [vmem:[%s7113_s4 + $0x60] sm:$0xff]   ;;  %v5532_v7 = vld [vmem:[%s7113_s4 + $0x70] sm:$0xff]  }
 0x121   :  { %4821 = vmatpush3.bf16.msra.mxu1 %v461_v6  ;;  %v5531_v6 = vld [vmem:[%s7113_s4 + $0x68] sm:$0xff]  }
 0x122   :  { %v372_v10 = vadd.f32 %v4504_v9, %v6005_v34  ;;  %v413_v11 = vmax.f32 %v369_v8, 0.0  ;;  %v5533_v8 = vld [vmem:[%s7113_s4 + $0x78] sm:$0xff]   ;;  %v5534_v9 = vld [vmem:[%s7113_s4 + $0x80] sm:$0xff]  }
 0x124   :  { %v414_v12 = vmax.f32 %v372_v10, 0.0  ;;  %v4505_v13 = vpop.f32.mrb[16].mxu0  ;;  %v5535_v10 = vld [vmem:[%s7113_s4 + $0x88] sm:$0xff]  }
 0x125   :  { %v4506_v14 = vpop.f32.mrb[17].mxu0 }
 0x126   :  { %v4507_v15 = vadd.f32 %v4506_v14, %v4505_v13  ;;  %v4508_v16 = vpop.f32.mrb[18].mxu0  ;;  %v462_v17 = vpack.c.bf16 %v414_v12, %v413_v11  ;;  %v5536_v11 = vld [vmem:[%s7115_s30] sm:$0xff]   ;;  %v5537_v12 = vld [vmem:[%s7115_s30 + $0x8] sm:$0xff]   ;;  %v5538_v13 = vld [vmem:[%s7115_s30 + $0x10] sm:$0xff]  }
 0x127   :  { %v4509_v18 = vpop.f32.mrb[19].mxu0  ;;  %4868 = vmatprep.subr.bf16.mxu0 %v5536_v11  ;;  %v5539_v14 = vld [vmem:[%s7115_s30 + $0x18] sm:$0xff]  }
 0x128   :  { %v377_v19 = vadd.f32 %v4507_v15, %v6005_v34  ;;  %v4510_v20 = vadd.f32 %v4509_v18, %v4508_v16  ;;  %4822 = vmatprep.subr.bf16.mxu1 %v462_v17  ;;  %4869 = vmatpush3.bf16.msra.mxu0 %v5536_v11  ;;  %v5540_v15 = vld [vmem:[%s7115_s30 + $0x20] sm:$0xff]   ;;  %v5541_v16 = vld [vmem:[%s7115_s30 + $0x28] sm:$0xff]   ;;  %v5543_v18 = vld [vmem:[%s7115_s30 + $0x38] sm:$0xff]  }
 0x129   :  { %4823 = vmatpush3.bf16.msra.mxu1 %v462_v17  ;;  %4870 = vmatprep.subr.bf16.mxu0 %v5537_v12  ;;  %v5542_v17 = vld [vmem:[%s7115_s30 + $0x30] sm:$0xff]  }
 0x12a   :  { %v380_v21 = vadd.f32 %v4510_v20, %v6005_v34  ;;  %v415_v22 = vmax.f32 %v377_v19, 0.0 }
 0x12c   :  { %v416_v23 = vmax.f32 %v380_v21, 0.0  ;;  %v4511_v24 = vpop.f32.mrb[20].mxu0  ;;  %4871 = vmatpush3.bf16.msra.mxu0 %v5537_v12 }
 0x12d   :  { %v4512_v25 = vpop.f32.mrb[21].mxu0  ;;  %4872 = vmatprep.subr.bf16.mxu0 %v5538_v13 }
 0x12e   :  { %v4513_v26 = vadd.f32 %v4512_v25, %v4511_v24  ;;  %v4514_v27 = vpop.f32.mrb[22].mxu0  ;;  %v463_v28 = vpack.c.bf16 %v416_v23, %v415_v22 }
 0x12f   :  { %v4515_v29 = vpop.f32.mrb[23].mxu0 }
 0x130   :  { %v385_v30 = vadd.f32 %v4513_v26, %v6005_v34  ;;  %v4516_v31 = vadd.f32 %v4515_v29, %v4514_v27  ;;  %4824 = vmatprep.subr.bf16.mxu1 %v463_v28  ;;  %4873 = vmatpush3.bf16.msra.mxu0 %v5538_v13 }
 0x131   :  { %4825 = vmatpush3.bf16.msra.mxu1 %v463_v28  ;;  %4874 = vmatprep.subr.bf16.mxu0 %v5539_v14 }
 0x132   :  { %v388_v32 = vadd.f32 %v4516_v31, %v6005_v34  ;;  %v417_v33 = vmax.f32 %v385_v30, 0.0 }
 0x134   :  { %v418_v35 = vmax.f32 %v388_v32, 0.0  ;;  %v4517_v36 = vpop.f32.mrb[24].mxu0  ;;  %4875 = vmatpush3.bf16.msra.mxu0 %v5539_v14 }
 0x135   :  { %v4518_v37 = vpop.f32.mrb[25].mxu0  ;;  %4876 = vmatprep.subr.bf16.mxu0 %v5540_v15 }
 0x136   :  { %v4519_v38 = vadd.f32 %v4518_v37, %v4517_v36  ;;  %v4520_v39 = vpop.f32.mrb[26].mxu0  ;;  %v464_v40 = vpack.c.bf16 %v418_v35, %v417_v33 }
 0x137   :  { %v4521_v41 = vpop.f32.mrb[27].mxu0 }
 0x138   :  { %v393_v42 = vadd.f32 %v4519_v38, %v6005_v34  ;;  %v4522_v43 = vadd.f32 %v4521_v41, %v4520_v39  ;;  %4826 = vmatprep.subr.bf16.mxu1 %v464_v40  ;;  %4877 = vmatpush3.bf16.msra.mxu0 %v5540_v15 }
 0x139   :  { %4827 = vmatpush3.bf16.msra.mxu1 %v464_v40  ;;  %4878 = vmatprep.subr.bf16.mxu0 %v5541_v16 }
 0x13a   :  { %v396_v44 = vadd.f32 %v4522_v43, %v6005_v34  ;;  %v419_v45 = vmax.f32 %v393_v42, 0.0 }
 0x13c   :  { %v420_v46 = vmax.f32 %v396_v44, 0.0  ;;  %v4523_v47 = vpop.f32.mrb[28].mxu0  ;;  %4879 = vmatpush3.bf16.msra.mxu0 %v5541_v16 }
 0x13d   :  { %v4524_v48 = vpop.f32.mrb[29].mxu0  ;;  %4880 = vmatprep.subr.bf16.mxu0 %v5542_v17 }
 0x13e   :  { %v4525_v49 = vadd.f32 %v4524_v48, %v4523_v47  ;;  %v4526_v50 = vpop.f32.mrb[30].mxu0  ;;  %v465_v51 = vpack.c.bf16 %v420_v46, %v419_v45 }
 0x13f   :  { %v4527_v52 = vpop.f32.mrb[31].mxu0 }
 0x140   :  { %v401_v53 = vadd.f32 %v4525_v49, %v6005_v34  ;;  %v4528_v54 = vadd.f32 %v4527_v52, %v4526_v50  ;;  %4828 = vmatprep.subr.bf16.mxu1 %v465_v51  ;;  %4881 = vmatpush3.bf16.msra.mxu0 %v5542_v17 }
 0x141   :  { %4829 = vmatpush3.bf16.msra.mxu1 %v465_v51  ;;  %4882 = vmatprep.subr.bf16.mxu0 %v5543_v18 }
 0x142   :  { %v404_v55 = vadd.f32 %v4528_v54, %v6005_v34  ;;  %v421_v56 = vmax.f32 %v401_v53, 0.0  ;;  %v5522_v34 = vld [vmem:[%s7113_s4 + $0x20] sm:$0xff]   ;;  %s7117_s4 = sld [smem:[#allocation12_spill]] }
 0x144   :  { %v422_v57 = vmax.f32 %v404_v55, 0.0  ;;  %4883 = vmatpush3.bf16.msra.mxu0 %v5543_v18 }
 0x146   :  { %v466_v58 = vpack.c.bf16 %v422_v57, %v421_v56 }
 0x148   :  { %4830 = vmatprep.subr.bf16.mxu1 %v466_v58 }
 0x149   :  { %4831 = vmatpush3.bf16.msra.mxu1 %v466_v58 }
 0x14c   :  { %4833 = vmatmul.mubr.bf16.vlgmr.msra.gmra.mrb[0].mxu1 %v5519_v59 }
 0x14d   :  { %4836 = vmatprep.mubr.bf16.mxu1 %v5520_v60 }
 0x154   :  { %4837 = vmatmul.mubr.bf16.gmra.mrb[4].mxu1 %v5521_v61 }
 0x155   :  { %4840 = vmatprep.mubr.bf16.mxu1 %v5522_v34 }
 0x15c   :  { %4841 = vmatmul.mubr.bf16.gmra.mrb[8].mxu1 %v5523_v62 }
 0x15d   :  { %4844 = vmatprep.mubr.bf16.mxu1 %v5524_v63 }
 0x164   :  { %4845 = vmatmul.mubr.bf16.gmra.mrb[12].mxu1 %v5525_v0 }
 0x165   :  { %4848 = vmatprep.mubr.bf16.mxu1 %v5526_v1 }
 0x16c   :  { %4849 = vmatmul.mubr.bf16.gmra.mrb[16].mxu1 %v5527_v2 }
 0x16d   :  { %4852 = vmatprep.mubr.bf16.mxu1 %v5528_v3 }
 0x174   :  { %4853 = vmatmul.mubr.bf16.gmra.mrb[20].mxu1 %v5529_v4 }
 0x175   :  { %4856 = vmatprep.mubr.bf16.mxu1 %v5530_v5 }
 0x17c   :  { %4857 = vmatmul.mubr.bf16.gmra.mrb[24].mxu1 %v5531_v6 }
 0x17d   :  { %4860 = vmatprep.mubr.bf16.mxu1 %v5532_v7 }
 0x184   :  { %4861 = vmatmul.mubr.bf16.gmra.mrb[28].mxu1 %v5533_v8 }
 0x185   :  { %4864 = vmatprep.mubr.bf16.mxu1 %v5534_v9 }
 0x18c   :  { %4865 = vmatmul.mubr.bf16.gmra.mrb[32].mxu1 %v5535_v10 }
 0x21f   :  { %v4834_v19 = vpop.f32.mrb[0].mxu1 }
 0x220   :  { %v609_v20 = vpop.f32.mrb[1].mxu1 }
 0x221   :  { %v4835_v21 = vpop.f32.mrb[2].mxu1 }
 0x222   :  { %v612_v22 = vpop.f32.mrb[3].mxu1 }
 0x227   :  { %v4838_v23 = vpop.f32.mrb[4].mxu1 }
 0x228   :  { %v754_v24 = vmax.f32 %v4834_v19, %v4838_v23  ;;  %v625_v25 = vpop.f32.mrb[5].mxu1 }
 0x229   :  { %v752_v26 = vmax.f32 %v609_v20, %v625_v25  ;;  %v4839_v27 = vpop.f32.mrb[6].mxu1  ;;  %v5544_v25 = vld [vmem:[%s7116_s8] sm:$0xff]  }
 0x22a   :  { %v755_v28 = vmax.f32 %v4835_v21, %v4839_v27  ;;  %v628_v29 = vpop.f32.mrb[7].mxu1  ;;  %v5557_v27 = vld [vmem:[%s7117_s4 + $0x48] sm:$0xff]  }
 0x22b   :  { %v753_v30 = vmax.f32 %v612_v22, %v628_v29  ;;  %v5559_v29 = vld [vmem:[%s7117_s4 + $0x58] sm:$0xff]  }
 0x22f   :  { %v4842_v31 = vpop.f32.mrb[8].mxu1 }
 0x230   :  { %v758_v32 = vmax.f32 %v754_v24, %v4842_v31  ;;  %v641_v33 = vpop.f32.mrb[9].mxu1  ;;  %v5563_v31 = vld [vmem:[%s7117_s4 + $0x68] sm:$0xff]  }
 0x231   :  { %v756_v35 = vmax.f32 %v752_v26, %v641_v33  ;;  %v4843_v36 = vpop.f32.mrb[10].mxu1  ;;  %v5554_v26 = vld [vmem:[%s7117_s4 + $0x40] sm:$0xff]  }
 0x232   :  { %v759_v37 = vmax.f32 %v755_v28, %v4843_v36  ;;  %v644_v38 = vpop.f32.mrb[11].mxu1  ;;  %4928 = vmatprep.subr.bf16.mxu1 %v5554_v26  ;;  %v5558_v28 = vld [vmem:[%s7117_s4 + $0x50] sm:$0xff]  }
 0x233   :  { %v757_v39 = vmax.f32 %v753_v30, %v644_v38  ;;  %4929 = vmatpush3.bf16.msra.mxu1 %v5554_v26  ;;  %v5561_v30 = vld [vmem:[%s7117_s4 + $0x60] sm:$0xff]  }
 0x234   :  { %4930 = vmatprep.subr.bf16.mxu1 %v5557_v27 }
 0x237   :  { %v4846_v40 = vpop.f32.mrb[12].mxu1  ;;  %4931 = vmatpush3.bf16.msra.mxu1 %v5557_v27  ;;  %v5572_v27 = vld [vmem:[%s7117_s4 + $0x20] sm:$0xff]  }
 0x238   :  { %v762_v41 = vmax.f32 %v758_v32, %v4846_v40  ;;  %v657_v42 = vpop.f32.mrb[13].mxu1  ;;  %4932 = vmatprep.subr.bf16.mxu1 %v5558_v28  ;;  %v4217_v32 = vld [vmem:[%s7118_s5] ss:$0 sm:$0xff] }
 0x239   :  { %v760_v43 = vmax.f32 %v756_v35, %v657_v42  ;;  %v4847_v44 = vpop.f32.mrb[14].mxu1 }
 0x23a   :  { %v763_v45 = vmax.f32 %v759_v37, %v4847_v44  ;;  %v660_v46 = vpop.f32.mrb[15].mxu1 }
 0x23b   :  { %v761_v47 = vmax.f32 %v757_v39, %v660_v46  ;;  %4933 = vmatpush3.bf16.msra.mxu1 %v5558_v28 }
 0x23c   :  { %4934 = vmatprep.subr.bf16.mxu1 %v5559_v29 }
 0x23f   :  { %v4850_v48 = vpop.f32.mrb[16].mxu1  ;;  %4935 = vmatpush3.bf16.msra.mxu1 %v5559_v29 }
 0x240   :  { %v766_v49 = vmax.f32 %v762_v41, %v4850_v48  ;;  %v673_v50 = vpop.f32.mrb[17].mxu1  ;;  %4936 = vmatprep.subr.bf16.mxu1 %v5561_v30  ;;  %v5545_v48 = vld [vmem:[%s7116_s8 + $0x8] sm:$0xff]  }
 0x241   :  { %v764_v51 = vmax.f32 %v760_v43, %v673_v50  ;;  %v4851_v52 = vpop.f32.mrb[18].mxu1  ;;  %v5547_v50 = vld [vmem:[%s7116_s8 + $0x18] sm:$0xff]  }
 0x242   :  { %v767_v53 = vmax.f32 %v763_v45, %v4851_v52  ;;  %v676_v54 = vpop.f32.mrb[19].mxu1  ;;  %v5549_v52 = vld [vmem:[%s7116_s8 + $0x28] sm:$0xff]  }
 0x243   :  { %v765_v55 = vmax.f32 %v761_v47, %v676_v54  ;;  %4937 = vmatpush3.bf16.msra.mxu1 %v5561_v30  ;;  %v5551_v54 = vld [vmem:[%s7116_s8 + $0x38] sm:$0xff]  }
 0x244   :  { %4938 = vmatprep.subr.bf16.mxu1 %v5563_v31 }
 0x247   :  { %v4854_v56 = vpop.f32.mrb[20].mxu1  ;;  %4939 = vmatpush3.bf16.msra.mxu1 %v5563_v31 }
 0x248   :  { %v770_v57 = vmax.f32 %v766_v49, %v4854_v56  ;;  %v689_v58 = vpop.f32.mrb[21].mxu1  ;;  %v5546_v49 = vld [vmem:[%s7116_s8 + $0x10] sm:$0xff]   ;;  %v5553_v56 = vld [vmem:[%s7116_s8 + $0x48] sm:$0xff]  }
 0x249   :  { %v768_v59 = vmax.f32 %v764_v51, %v689_v58  ;;  %v4855_v60 = vpop.f32.mrb[22].mxu1  ;;  %v5548_v51 = vld [vmem:[%s7116_s8 + $0x20] sm:$0xff]   ;;  %v5556_v58 = vld [vmem:[%s7116_s8 + $0x58] sm:$0xff]  }
 0x24a   :  { %v771_v61 = vmax.f32 %v767_v53, %v4855_v60  ;;  %v692_v34 = vpop.f32.mrb[23].mxu1  ;;  %v5550_v53 = vld [vmem:[%s7116_s8 + $0x30] sm:$0xff]   ;;  %v5562_v60 = vld [vmem:[%s7116_s8 + $0x68] sm:$0xff]  }
 0x24b   :  { %v769_v62 = vmax.f32 %v765_v55, %v692_v34  ;;  %v5552_v55 = vld [vmem:[%s7116_s8 + $0x40] sm:$0xff]   ;;  %v5565_v34 = vld [vmem:[%s7117_s4 + $0x78] sm:$0xff]  }
 0x24f   :  { %v4858_v63 = vpop.f32.mrb[24].mxu1 }
 0x250   :  { %v774_v0 = vmax.f32 %v770_v57, %v4858_v63  ;;  %v705_v1 = vpop.f32.mrb[25].mxu1  ;;  %v5555_v57 = vld [vmem:[%s7116_s8 + $0x50] sm:$0xff]  }
 0x251   :  { %v772_v2 = vmax.f32 %v768_v59, %v705_v1  ;;  %v4859_v3 = vpop.f32.mrb[26].mxu1  ;;  %v5560_v59 = vld [vmem:[%s7116_s8 + $0x60] sm:$0xff]   ;;  %v5567_v63 = vld [vmem:[%s7116_s8 + $0x70] sm:$0xff]  }
 0x252   :  { %v775_v4 = vmax.f32 %v771_v61, %v4859_v3  ;;  %v708_v5 = vpop.f32.mrb[27].mxu1  ;;  %v5564_v61 = vld [vmem:[%s7117_s4 + $0x70] sm:$0xff]   ;;  %v5577_v1 = vld [vmem:[%s7116_s8 + $0x80] sm:$0xff]  }
 0x253   :  { %v773_v6 = vmax.f32 %v769_v62, %v708_v5  ;;  %4940 = vmatprep.subr.bf16.mxu1 %v5564_v61  ;;  %v5566_v62 = vld [vmem:[%s7117_s4] sm:$0xff]  }
 0x254   :  { %4941 = vmatpush3.bf16.msra.mxu1 %v5564_v61 }
 0x255   :  { %4942 = vmatprep.subr.bf16.mxu1 %v5565_v34 }
 0x257   :  { %v4862_v7 = vpop.f32.mrb[28].mxu1 }
 0x258   :  { %v778_v8 = vmax.f32 %v774_v0, %v4862_v7  ;;  %v721_v9 = vpop.f32.mrb[29].mxu1  ;;  %4943 = vmatpush3.bf16.msra.mxu1 %v5565_v34  ;;  %v5568_v0 = vld [vmem:[%s7116_s8 + $0x78] sm:$0xff]   ;;  %v5586_v34 = vld [vmem:[%s7117_s4 + $0xc0] sm:$0xff]  }
 0x259   :  { %v776_v10 = vmax.f32 %v772_v2, %v721_v9  ;;  %v4863_v11 = vpop.f32.mrb[30].mxu1  ;;  %4948 = vmatprep.subr.bf16.mxu1 %v5566_v62  ;;  %v5578_v2 = vld [vmem:[%s7116_s8 + $0x88] sm:$0xff]  }
 0x25a   :  { %v779_v12 = vmax.f32 %v775_v4, %v4863_v11  ;;  %v724_v13 = vpop.f32.mrb[31].mxu1 }
 0x25b   :  { %v777_v14 = vmax.f32 %v773_v6, %v724_v13 }
 0x25f   :  { %v4866_v15 = vpop.f32.mrb[32].mxu1 }
 0x260   :  { %v782_v16 = vmax.f32 %v778_v8, %v4866_v15  ;;  %v737_v17 = vpop.f32.mrb[33].mxu1  ;;  %v5569_v15 = vld [vmem:[%s7117_s4 + $0x8] sm:$0xff]  }
 0x261   :  { %v780_v18 = vmax.f32 %v776_v10, %v737_v17  ;;  %v4867_v19 = vpop.f32.mrb[34].mxu1  ;;  %v5570_v17 = vld [vmem:[%s7117_s4 + $0x10] sm:$0xff]  }
 0x262   :  { %v783_v20 = vmax.f32 %v779_v12, %v4867_v19  ;;  %v740_v21 = vpop.f32.mrb[35].mxu1 }
 0x263   :  { %v781_v22 = vmax.f32 %v777_v14, %v740_v21 }
 0x264   :  { %v6098_v23 = vpack.c.bf16 %v783_v20, %v782_v16 }
 0x265   :  { %v6100_v24 = vpack.c.bf16 %v781_v22, %v780_v18 }
 0x267   :  { %4884 = vmatprep.mubr.bf16.mxu0 %v6100_v24 }
 0x268   :  { %4885 = vmatmul.mubr.bf16.vlgmr.msra.gmra.mrb[32].mxu0 %v6098_v23 }
 0x269   :  { %4892 = vmatprep.mubr.msk.bf16.mxu0 %vm1038_vm0, %v5544_v25  ;;  %v5571_v25 = vld [vmem:[%s7117_s4 + $0x18] sm:$0xff]  }
 0x33b   :  { %v4886_v33 = vpop.f32.mrb[32].mxu0 }
 0x33c   :  { %v900_v35 = vadd.f32 %v4886_v33, %v4217_v32  ;;  %v891_v36 = vpop.f32.mrb[33].mxu0  ;;  %v5573_v33 = vld [vmem:[%s7117_s4 + $0x28] sm:$0xff]  }
 0x33d   :  { %v892_v37 = vadd.f32 %v4217_v32, %v891_v36  ;;  %v4887_v38 = vpop.f32.mrb[34].mxu0  ;;  %v5574_v36 = vld [vmem:[%s7117_s4 + $0x30] sm:$0xff]  }
 0x33e   :  { %v903_v39 = vadd.f32 %v4887_v38, %v4217_v32  ;;  %v894_v40 = vpop.f32.mrb[35].mxu0  ;;  %v908_v42 = vmax.f32 %v900_v35, 0.0 }
 0x33f   :  { %v895_v41 = vadd.f32 %v4217_v32, %v894_v40  ;;  %v906_v44 = vmax.f32 %v892_v37, 0.0 }
 0x340   :  { %v909_v43 = vmax.f32 %v903_v39, 0.0 }
 0x341   :  { %v907_v45 = vmax.f32 %v895_v41, 0.0 }
 0x342   :  { %v947_v46 = vpack.c.bf16 %v909_v43, %v908_v42  ;;  %v5575_v42 = vld [vmem:[%s7117_s4 + $0x38] sm:$0xff]  }
 0x343   :  { %v946_v47 = vpack.c.bf16 %v907_v45, %v906_v44  ;;  %v5576_v44 = vld [vmem:[%s7117_s4 + $0x80] sm:$0xff]  }
 0x345   :  { %4888 = vmatprep.subr.bf16.mxu0 %v946_v47 }
 0x346   :  { %4889 = vmatpush3.bf16.msra.mxu0 %v946_v47 }
 0x347   :  { %4890 = vmatprep.subr.bf16.mxu0 %v947_v46 }
 0x34a   :  { %4891 = vmatpush3.bf16.msra.mxu0 %v947_v46 }
 0x34d   :  { %4893 = vmatmul.mubr.msk.bf16.vlgmr.msra.gmra.mrb[36].mxu0 %vm1038_vm0, %v5545_v48 }
 0x34e   :  { %4896 = vmatprep.mubr.msk.bf16.mxu0 %vm1038_vm0, %v5546_v49 }
 0x355   :  { %4897 = vmatmul.mubr.msk.bf16.gmra.mrb[40].mxu0 %vm1038_vm0, %v5547_v50  ;;  %v5579_v50 = vld [vmem:[%s7117_s4 + $0x88] sm:$0xff]  }
 0x356   :  { %4900 = vmatprep.mubr.msk.bf16.mxu0 %vm1038_vm0, %v5548_v51  ;;  %v5580_v51 = vld [vmem:[%s7117_s4 + $0x90] sm:$0xff]  }
 0x35d   :  { %4901 = vmatmul.mubr.msk.bf16.gmra.mrb[44].mxu0 %vm1038_vm0, %v5549_v52  ;;  %v5581_v52 = vld [vmem:[%s7117_s4 + $0x98] sm:$0xff]  }
 0x35e   :  { %4904 = vmatprep.mubr.msk.bf16.mxu0 %vm1038_vm0, %v5550_v53  ;;  %v5582_v53 = vld [vmem:[%s7117_s4 + $0xa0] sm:$0xff]  }
 0x365   :  { %4905 = vmatmul.mubr.msk.bf16.gmra.mrb[48].mxu0 %vm1038_vm0, %v5551_v54  ;;  %v5583_v54 = vld [vmem:[%s7117_s4 + $0xa8] sm:$0xff]  }
 0x366   :  { %4908 = vmatprep.mubr.msk.bf16.mxu0 %vm1038_vm0, %v5552_v55  ;;  %v5584_v55 = vld [vmem:[%s7117_s4 + $0xb0] sm:$0xff]  }
 0x36d   :  { %4909 = vmatmul.mubr.msk.bf16.gmra.mrb[52].mxu0 %vm1038_vm0, %v5553_v56 }
 0x36e   :  { %4912 = vmatprep.mubr.msk.bf16.mxu0 %vm1038_vm0, %v5555_v57  ;;  %v5585_v57 = vld [vmem:[%s7117_s4 + $0xb8] sm:$0xff]  }
 0x375   :  { %4913 = vmatmul.mubr.msk.bf16.gmra.mrb[56].mxu0 %vm1038_vm0, %v5556_v58 }
 0x376   :  { %4916 = vmatprep.mubr.msk.bf16.mxu0 %vm1038_vm0, %v5560_v59 }
 0x37d   :  { %4917 = vmatmul.mubr.msk.bf16.gmra.mrb[60].mxu0 %vm1038_vm0, %v5562_v60 }
 0x37e   :  { %4920 = vmatprep.mubr.msk.bf16.mxu0 %vm1038_vm0, %v5567_v63  ;;  %v5587_v63 = vld [vmem:[%s7117_s4 + $0xc8] sm:$0xff]  }
 0x385   :  { %4921 = vmatmul.mubr.msk.bf16.gmra.mrb[64].mxu0 %vm1038_vm0, %v5568_v0  ;;  %v5588_v0 = vld [vmem:[%s7117_s4 + $0xd0] sm:$0xff]  }
 0x386   :  { %4924 = vmatprep.mubr.msk.bf16.mxu0 %vm1038_vm0, %v5577_v1  ;;  %v5589_v1 = vld [vmem:[%s7117_s4 + $0xd8] sm:$0xff]  }
 0x38d   :  { %4925 = vmatmul.mubr.msk.bf16.gmra.mrb[68].mxu0 %vm1038_vm0, %v5578_v2  ;;  %v5590_v2 = vld [vmem:[%s7117_s4 + $0xe0] sm:$0xff]  }
 0x420   :  { %v6206_v3 = vpop.f32.mrb[36].mxu0 }
 0x421   :  { %v1127_v4 = vpop.f32.mrb[37].mxu0 }
 0x422   :  { %v4895_v5 = vpop.f32.mrb[38].mxu0 }
 0x423   :  { %v1287_v6 = vpack.c.bf16 %v4895_v5, %v6206_v3  ;;  %v1130_v7 = vpop.f32.mrb[39].mxu0  ;;  %v5591_v3 = vld [vmem:[%s7117_s4 + $0xe8] sm:$0xff]   ;;  %v5593_v5 = vld [vmem:[%s7117_s4 + $0xf8] sm:$0xff]  }
 0x424   :  { %v1286_v8 = vpack.c.bf16 %v1130_v7, %v1127_v4  ;;  %v5592_v4 = vld [vmem:[%s7117_s4 + $0xf0] sm:$0xff]  }
 0x428   :  { %v4898_v9 = vpop.f32.mrb[40].mxu0 }
 0x429   :  { %v1143_v10 = vpop.f32.mrb[41].mxu0 }
 0x42a   :  { %v4899_v11 = vpop.f32.mrb[42].mxu0 }
 0x42b   :  { %v1305_v12 = vpack.c.bf16 %v4899_v11, %v4898_v9  ;;  %v1146_v13 = vpop.f32.mrb[43].mxu0  ;;  %v5594_v9 = vld [vmem:[%s7117_s4 + $0x100] sm:$0xff]  }
 0x42c   :  { %v1304_v14 = vpack.c.bf16 %v1146_v13, %v1143_v10  ;;  %v5595_v13 = vld [vmem:[%s7117_s4 + $0x108] sm:$0xff]  }
 0x42e   :  { %4944 = vmatprep.mubr.bf16.mxu1 %v1304_v14  ;;  %v5596_v14 = vld [vmem:[%s7117_s4 + $0x110] sm:$0xff]  }
 0x42f   :  { %4945 = vmatmul.mubr.bf16.vlgmr.msra.gmra.mrb[36].mxu1 %v1305_v12 }
 0x430   :  { %4949 = vmatpush3.bf16.msra.mxu1 %v5566_v62  ;;  %4964 = vmatprep.mubr.bf16.mxu1 %v1286_v8  ;;  %v6212_v16 = vpop.f32.mrb[44].mxu0 }
 0x431   :  { %4950 = vmatprep.subr.bf16.mxu1 %v5569_v15  ;;  %v1159_v18 = vpop.f32.mrb[45].mxu0 }
 0x432   :  { %v6217_v19 = vpop.f32.mrb[46].mxu0 }
 0x433   :  { %v1517_v20 = vpack.c.bf16 %v6217_v19, %v6212_v16  ;;  %v1162_v21 = vpop.f32.mrb[47].mxu0  ;;  %v5598_v16 = vld [vmem:[%s7117_s4 + $0x120] sm:$0xff]   ;;  %v5601_v19 = vld [vmem:[%s7117_s4 + $0x138] sm:$0xff]  }
 0x434   :  { %4951 = vmatpush3.bf16.msra.mxu1 %v5569_v15  ;;  %v1516_v22 = vpack.c.bf16 %v1162_v21, %v1159_v18  ;;  %v5597_v15 = vld [vmem:[%s7117_s4 + $0x118] sm:$0xff]   ;;  %v5600_v18 = vld [vmem:[%s7117_s4 + $0x130] sm:$0xff]  }
 0x435   :  { %4952 = vmatprep.subr.bf16.mxu1 %v5570_v17 }
 0x438   :  { %4953 = vmatpush3.bf16.msra.mxu1 %v5570_v17  ;;  %v6224_v26 = vpop.f32.mrb[48].mxu0  ;;  %v5599_v17 = vld [vmem:[%s7117_s4 + $0x128] sm:$0xff]  }
 0x439   :  { %4954 = vmatprep.subr.bf16.mxu1 %v5571_v25  ;;  %v6229_v28 = vpop.f32.mrb[49].mxu0 }
 0x43a   :  { %v6231_v29 = vpop.f32.mrb[50].mxu0 }
 0x43b   :  { %v1636_v30 = vpack.c.bf16 %v6231_v29, %v6224_v26  ;;  %v6235_v31 = vpop.f32.mrb[51].mxu0  ;;  %v5603_v29 = vld [vmem:[%s7117_s4 + $0x148] sm:$0xff]  }
 0x43c   :  { %4955 = vmatpush3.bf16.msra.mxu1 %v5571_v25  ;;  %v1635_v32 = vpack.c.bf16 %v6235_v31, %v6229_v28  ;;  %v5635_v31 = vld [vmem:[%s7080_s9 + $0x8] sm:$0xff]  }
 0x43d   :  { %4956 = vmatprep.subr.bf16.mxu1 %v5572_v27 }
 0x440   :  { %4957 = vmatpush3.bf16.msra.mxu1 %v5572_v27  ;;  %v6242_v35 = vpop.f32.mrb[52].mxu0  ;;  %v5602_v27 = vld [vmem:[%s7117_s4 + $0x140] sm:$0xff]  }
 0x441   :  { %4958 = vmatprep.subr.bf16.mxu1 %v5573_v33  ;;  %v6247_v37 = vpop.f32.mrb[53].mxu0 }
 0x442   :  { %v6249_v38 = vpop.f32.mrb[54].mxu0 }
 0x443   :  { %v1755_v39 = vpack.c.bf16 %v6249_v38, %v6242_v35  ;;  %v6253_v40 = vpop.f32.mrb[55].mxu0  ;;  %v5605_v35 = vld [vmem:[%s7117_s4 + $0x158] sm:$0xff]   ;;  %v5638_v38 = vld [vmem:[%s7080_s9 + $0x20] sm:$0xff]  }
 0x444   :  { %4959 = vmatpush3.bf16.msra.mxu1 %v5573_v33  ;;  %v1754_v41 = vpack.c.bf16 %v6253_v40, %v6247_v37  ;;  %v5636_v33 = vld [vmem:[%s7080_s9 + $0x10] sm:$0xff]   ;;  %v5606_v37 = vld [vmem:[%s7117_s4 + $0x160] sm:$0xff]   ;;  %v5639_v40 = vld [vmem:[%s7080_s9 + $0x28] sm:$0xff]  }
 0x445   :  { %4960 = vmatprep.subr.bf16.mxu1 %v5574_v36 }
 0x448   :  { %4961 = vmatpush3.bf16.msra.mxu1 %v5574_v36  ;;  %v6260_v43 = vpop.f32.mrb[56].mxu0  ;;  %v5637_v36 = vld [vmem:[%s7080_s9 + $0x18] sm:$0xff]  }
 0x449   :  { %4962 = vmatprep.subr.bf16.mxu1 %v5575_v42  ;;  %v6265_v45 = vpop.f32.mrb[57].mxu0 }
 0x44a   :  { %v6267_v46 = vpop.f32.mrb[58].mxu0 }
 0x44b   :  { %v1874_v47 = vpack.c.bf16 %v6267_v46, %v6260_v43  ;;  %v6271_v48 = vpop.f32.mrb[59].mxu0  ;;  %v5614_v43 = vld [vmem:[%s7117_s4 + $0x1a0] sm:$0xff]   ;;  %v5615_v46 = vld [vmem:[%s7117_s4 + $0x1a8] sm:$0xff]  }
 0x44c   :  { %4963 = vmatpush3.bf16.msra.mxu1 %v5575_v42  ;;  %v1873_v49 = vpack.c.bf16 %v6271_v48, %v6265_v45  ;;  %v5640_v42 = vld [vmem:[%s7080_s9 + $0x30] sm:$0xff]   ;;  %v5610_v45 = vld [vmem:[%s7117_s4 + $0x180] sm:$0xff]   ;;  %v5611_v48 = vld [vmem:[%s7117_s4 + $0x188] sm:$0xff]  }
 0x44d   :  { %4968 = vmatprep.subr.bf16.mxu1 %v5576_v44 }
 0x44f   :  { %4965 = vmatmul.mubr.bf16.vlgmr.msra.gmra.mrb[36].mxu1 %v1287_v6 }
 0x450   :  { %4969 = vmatpush3.bf16.msra.mxu1 %v5576_v44  ;;  %4984 = vmatprep.mubr.bf16.mxu1 %v1516_v22  ;;  %v6293_v56 = vpop.f32.mrb[60].mxu0  ;;  %v5609_v44 = vld [vmem:[%s7117_s4 + $0x178] sm:$0xff]  }
 0x451   :  { %4970 = vmatprep.subr.bf16.mxu1 %v5579_v50  ;;  %v6298_v58 = vpop.f32.mrb[61].mxu0 }
 0x452   :  { %v6300_v59 = vpop.f32.mrb[62].mxu0 }
 0x453   :  { %v1993_v60 = vpack.c.bf16 %v6300_v59, %v6293_v56  ;;  %v6304_v61 = vpop.f32.mrb[63].mxu0  ;;  %v5622_v56 = vld [vmem:[%s7117_s4 + $0x1e0] sm:$0xff]   ;;  %v5625_v59 = vld [vmem:[%s7117_s4 + $0x1f8] sm:$0xff]  }
 0x454   :  { %4971 = vmatpush3.bf16.msra.mxu1 %v5579_v50  ;;  %v1992_v62 = vpack.c.bf16 %v6304_v61, %v6298_v58  ;;  %v5613_v50 = vld [vmem:[%s7117_s4 + $0x198] sm:$0xff]   ;;  %v5624_v58 = vld [vmem:[%s7117_s4 + $0x1f0] sm:$0xff]   ;;  %v5627_v61 = vld [vmem:[%s7117_s4 + $0x208] sm:$0xff]  }
 0x455   :  { %4972 = vmatprep.subr.bf16.mxu1 %v5580_v51 }
 0x458   :  { %4973 = vmatpush3.bf16.msra.mxu1 %v5580_v51  ;;  %v6335_v6 = vpop.f32.mrb[64].mxu0  ;;  %v5617_v51 = vld [vmem:[%s7117_s4 + $0x1b8] sm:$0xff]  }
 0x459   :  { %4974 = vmatprep.subr.bf16.mxu1 %v5581_v52  ;;  %v6337_v7 = vpop.f32.mrb[65].mxu0 }
 0x45a   :  { %v6339_v8 = vpop.f32.mrb[66].mxu0 }
 0x45b   :  { %v2112_v10 = vpack.c.bf16 %v6339_v8, %v6335_v6  ;;  %v6346_v11 = vpop.f32.mrb[67].mxu0 }
 0x45c   :  { %4975 = vmatpush3.bf16.msra.mxu1 %v5581_v52  ;;  %v2111_v12 = vpack.c.bf16 %v6346_v11, %v6337_v7  ;;  %v5618_v52 = vld [vmem:[%s7117_s4 + $0x1c0] sm:$0xff]  }
 0x45d   :  { %4976 = vmatprep.subr.bf16.mxu1 %v5582_v53 }
 0x460   :  { %4977 = vmatpush3.bf16.msra.mxu1 %v5582_v53  ;;  %v5619_v53 = vld [vmem:[%s7117_s4 + $0x1c8] sm:$0xff]  }
 0x461   :  { %4978 = vmatprep.subr.bf16.mxu1 %v5583_v54 }
 0x464   :  { %4979 = vmatpush3.bf16.msra.mxu1 %v5583_v54  ;;  %v5620_v54 = vld [vmem:[%s7117_s4 + $0x1d0] sm:$0xff]  }
 0x465   :  { %4980 = vmatprep.subr.bf16.mxu1 %v5584_v55 }
 0x468   :  { %4981 = vmatpush3.bf16.msra.mxu1 %v5584_v55  ;;  %v5621_v55 = vld [vmem:[%s7117_s4 + $0x1d8] sm:$0xff]  }
 0x469   :  { %4982 = vmatprep.subr.bf16.mxu1 %v5585_v57 }
 0x46c   :  { %4983 = vmatpush3.bf16.msra.mxu1 %v5585_v57  ;;  %v5623_v57 = vld [vmem:[%s7117_s4 + $0x1e8] sm:$0xff]  }
 0x46d   :  { %4988 = vmatprep.subr.bf16.mxu1 %v5586_v34 }
 0x46f   :  { %4985 = vmatmul.mubr.bf16.vlgmr.msra.gmra.mrb[36].mxu1 %v1517_v20  ;;  %v6377_v20 = vpop.f32.mrb[68].mxu0 }
 0x470   :  { %4989 = vmatpush3.bf16.msra.mxu1 %v5586_v34  ;;  %5004 = vmatprep.mubr.bf16.mxu1 %v1635_v32  ;;  %v6379_v21 = vpop.f32.mrb[69].mxu0  ;;  %v5604_v32 = vld [vmem:[%s7117_s4 + $0x150] sm:$0xff]  }
 0x471   :  { %4990 = vmatprep.subr.bf16.mxu1 %v5587_v63  ;;  %v6381_v22 = vpop.f32.mrb[70].mxu0  ;;  %v5628_v34 = vld [vmem:[%s7117_s4 + $0x210] sm:$0xff]  }
 0x472   :  { %v2231_v25 = vpack.c.bf16 %v6381_v22, %v6377_v20  ;;  %v6385_v26 = vpop.f32.mrb[71].mxu0  ;;  %v5643_v20 = vld [vmem:[%s7082_s11 + $0x8] sm:$0xff]   ;;  %v5645_v22 = vld [vmem:[%s7082_s11 + $0x18] sm:$0xff]  }
 0x473   :  { %v2230_v28 = vpack.c.bf16 %v6385_v26, %v6379_v21  ;;  %v5644_v21 = vld [vmem:[%s7082_s11 + $0x10] sm:$0xff]  }
 0x474   :  { %4991 = vmatpush3.bf16.msra.mxu1 %v5587_v63  ;;  %v5630_v63 = vld [vmem:[%s7117_s4 + $0x220] sm:$0xff]   ;;  %v5648_v26 = vld [vmem:[%s7082_s11 + $0x30] sm:$0xff]  }
 0x475   :  { %4992 = vmatprep.subr.bf16.mxu1 %v5588_v0 }
 0x478   :  { %4993 = vmatpush3.bf16.msra.mxu1 %v5588_v0  ;;  %v5631_v0 = vld [vmem:[%s7117_s4 + $0x228] sm:$0xff]  }
 0x479   :  { %4994 = vmatprep.subr.bf16.mxu1 %v5589_v1 }
 0x47c   :  { %4995 = vmatpush3.bf16.msra.mxu1 %v5589_v1  ;;  %v5632_v1 = vld [vmem:[%s7117_s4 + $0x230] sm:$0xff]  }
 0x47d   :  { %4996 = vmatprep.subr.bf16.mxu1 %v5590_v2 }
 0x480   :  { %4997 = vmatpush3.bf16.msra.mxu1 %v5590_v2  ;;  %v5633_v2 = vld [vmem:[%s7117_s4 + $0x238] sm:$0xff]  }
 0x481   :  { %4998 = vmatprep.subr.bf16.mxu1 %v5591_v3 }
 0x484   :  { %4999 = vmatpush3.bf16.msra.mxu1 %v5591_v3  ;;  %v5641_v3 = vld [vmem:[%s7080_s9 + $0x38] sm:$0xff]  }
 0x485   :  { %5000 = vmatprep.subr.bf16.mxu1 %v5592_v4 }
 0x488   :  { %5001 = vmatpush3.bf16.msra.mxu1 %v5592_v4  ;;  %v5642_v4 = vld [vmem:[%s7082_s11] sm:$0xff]  }
 0x489   :  { %5002 = vmatprep.subr.bf16.mxu1 %v5593_v5 }
 0x48c   :  { %5003 = vmatpush3.bf16.msra.mxu1 %v5593_v5  ;;  %v4334_v5 = vld [vmem:[%s7119_s2] ss:$0 sm:$0xff] }
 0x48d   :  { %5008 = vmatprep.subr.bf16.mxu1 %v5594_v9 }
 0x48f   :  { %5005 = vmatmul.mubr.bf16.vlgmr.msra.gmra.mrb[36].mxu1 %v1636_v30  ;;  %v5634_v30 = vld [vmem:[%s7080_s9] sm:$0xff]  }
 0x490   :  { %5009 = vmatpush3.bf16.msra.mxu1 %v5594_v9  ;;  %5024 = vmatprep.mubr.bf16.mxu1 %v1754_v41  ;;  %v5608_v41 = vld [vmem:[%s7117_s4 + $0x170] sm:$0xff]  }
 0x491   :  { %5010 = vmatprep.subr.bf16.mxu1 %v5595_v13  ;;  %5108 = vmatprep.subr.bf16.mxu0 %v5634_v30 }
 0x492   :  { %5109 = vmatpush3.bf16.msra.mxu0 %v5634_v30  ;;  %v5652_v30 = vld [vmem:[%s7084_s13 + $0x10] sm:$0xff]  }
 0x493   :  { %5110 = vmatprep.subr.bf16.mxu0 %v5635_v31 }
 0x494   :  { %5011 = vmatpush3.bf16.msra.mxu1 %v5595_v13 }
 0x495   :  { %5012 = vmatprep.subr.bf16.mxu1 %v5596_v14 }
 0x496   :  { %5111 = vmatpush3.bf16.msra.mxu0 %v5635_v31  ;;  %v5653_v31 = vld [vmem:[%s7084_s13 + $0x18] sm:$0xff]  }
 0x497   :  { %5112 = vmatprep.subr.bf16.mxu0 %v5636_v33 }
 0x498   :  { %5013 = vmatpush3.bf16.msra.mxu1 %v5596_v14 }
 0x499   :  { %5014 = vmatprep.subr.bf16.mxu1 %v5597_v15 }
 0x49a   :  { %5113 = vmatpush3.bf16.msra.mxu0 %v5636_v33  ;;  %v5656_v33 = vld [vmem:[%s7084_s13 + $0x30] sm:$0xff]  }
 0x49b   :  { %5114 = vmatprep.subr.bf16.mxu0 %v5637_v36 }
 0x49c   :  { %5015 = vmatpush3.bf16.msra.mxu1 %v5597_v15 }
 0x49d   :  { %5016 = vmatprep.subr.bf16.mxu1 %v5598_v16 }
 0x49e   :  { %5115 = vmatpush3.bf16.msra.mxu0 %v5637_v36  ;;  %v4335_v36 = vld [vmem:[%s7081_s10] ss:$0 sm:$0xff] }
 0x49f   :  { %5116 = vmatprep.subr.bf16.mxu0 %v5638_v38 }
 0x4a0   :  { %5017 = vmatpush3.bf16.msra.mxu1 %v5598_v16 }
 0x4a1   :  { %5018 = vmatprep.subr.bf16.mxu1 %v5599_v17 }
 0x4a2   :  { %5117 = vmatpush3.bf16.msra.mxu0 %v5638_v38 }
 0x4a3   :  { %5118 = vmatprep.subr.bf16.mxu0 %v5639_v40 }
 0x4a4   :  { %5019 = vmatpush3.bf16.msra.mxu1 %v5599_v17 }
 0x4a5   :  { %5020 = vmatprep.subr.bf16.mxu1 %v5600_v18 }
 0x4a6   :  { %5119 = vmatpush3.bf16.msra.mxu0 %v5639_v40 }
 0x4a7   :  { %5120 = vmatprep.subr.bf16.mxu0 %v5640_v42 }
 0x4a8   :  { %5021 = vmatpush3.bf16.msra.mxu1 %v5600_v18 }
 0x4a9   :  { %5022 = vmatprep.subr.bf16.mxu1 %v5601_v19 }
 0x4aa   :  { %5121 = vmatpush3.bf16.msra.mxu0 %v5640_v42 }
 0x4ab   :  { %5122 = vmatprep.subr.bf16.mxu0 %v5641_v3 }
 0x4ac   :  { %5023 = vmatpush3.bf16.msra.mxu1 %v5601_v19 }
 0x4ad   :  { %5028 = vmatprep.subr.bf16.mxu1 %v5602_v27 }
 0x4ae   :  { %5123 = vmatpush3.bf16.msra.mxu0 %v5641_v3 }
 0x4af   :  { %5025 = vmatmul.mubr.bf16.vlgmr.msra.gmra.mrb[36].mxu1 %v1755_v39  ;;  %v5607_v39 = vld [vmem:[%s7117_s4 + $0x168] sm:$0xff]   ;;  %5128 = vmatprep.subr.bf16.mxu0 %v5642_v4 }
 0x4b0   :  { %5029 = vmatpush3.bf16.msra.mxu1 %v5602_v27  ;;  %5044 = vmatprep.mubr.bf16.mxu1 %v1873_v49  ;;  %v5612_v49 = vld [vmem:[%s7117_s4 + $0x190] sm:$0xff]   ;;  %v5649_v27 = vld [vmem:[%s7082_s11 + $0x38] sm:$0xff]  }
 0x4b1   :  { %5030 = vmatprep.subr.bf16.mxu1 %v5603_v29 }
 0x4b4   :  { %5031 = vmatpush3.bf16.msra.mxu1 %v5603_v29  ;;  %v5651_v29 = vld [vmem:[%s7084_s13 + $0x8] sm:$0xff]  }
 0x4b5   :  { %5032 = vmatprep.subr.bf16.mxu1 %v5604_v32 }
 0x4b8   :  { %5033 = vmatpush3.bf16.msra.mxu1 %v5604_v32  ;;  %v5654_v32 = vld [vmem:[%s7084_s13 + $0x20] sm:$0xff]  }
 0x4b9   :  { %5034 = vmatprep.subr.bf16.mxu1 %v5605_v35 }
 0x4bc   :  { %5035 = vmatpush3.bf16.msra.mxu1 %v5605_v35  ;;  %v5657_v35 = vld [vmem:[%s7084_s13 + $0x38] sm:$0xff]  }
 0x4bd   :  { %5036 = vmatprep.subr.bf16.mxu1 %v5606_v37 }
 0x4c0   :  { %5037 = vmatpush3.bf16.msra.mxu1 %v5606_v37  ;;  %v4344_v37 = vld [vmem:[%s7083_s12] ss:$0 sm:$0xff] }
 0x4c1   :  { %5038 = vmatprep.subr.bf16.mxu1 %v5607_v39  ;;  %v5431_v38 = vadd.f32 %v4344_v37, %v4335_v36 }
 0x4c4   :  { %5039 = vmatpush3.bf16.msra.mxu1 %v5607_v39 }
 0x4c5   :  { %5040 = vmatprep.subr.bf16.mxu1 %v5608_v41 }
 0x4c8   :  { %5041 = vmatpush3.bf16.msra.mxu1 %v5608_v41 }
 0x4c9   :  { %5042 = vmatprep.subr.bf16.mxu1 %v5609_v44 }
 0x4cc   :  { %5043 = vmatpush3.bf16.msra.mxu1 %v5609_v44 }
 0x4cd   :  { %5048 = vmatprep.subr.bf16.mxu1 %v5610_v45 }
 0x4cf   :  { %5045 = vmatmul.mubr.bf16.vlgmr.msra.gmra.mrb[36].mxu1 %v1874_v47  ;;  %v5616_v47 = vld [vmem:[%s7117_s4 + $0x1b0] sm:$0xff]  }
 0x4d0   :  { %5049 = vmatpush3.bf16.msra.mxu1 %v5610_v45  ;;  %5064 = vmatprep.mubr.bf16.mxu1 %v1992_v62  ;;  %v5629_v62 = vld [vmem:[%s7117_s4 + $0x218] sm:$0xff]  }
 0x4d1   :  { %5050 = vmatprep.subr.bf16.mxu1 %v5611_v48 }
 0x4d4   :  { %5051 = vmatpush3.bf16.msra.mxu1 %v5611_v48 }
 0x4d5   :  { %5052 = vmatprep.subr.bf16.mxu1 %v5612_v49 }
 0x4d8   :  { %5053 = vmatpush3.bf16.msra.mxu1 %v5612_v49 }
 0x4d9   :  { %5054 = vmatprep.subr.bf16.mxu1 %v5613_v50 }
 0x4dc   :  { %5055 = vmatpush3.bf16.msra.mxu1 %v5613_v50 }
 0x4dd   :  { %5056 = vmatprep.subr.bf16.mxu1 %v5614_v43 }
 0x4e0   :  { %5057 = vmatpush3.bf16.msra.mxu1 %v5614_v43 }
 0x4e1   :  { %5058 = vmatprep.subr.bf16.mxu1 %v5615_v46 }
 0x4e4   :  { %5059 = vmatpush3.bf16.msra.mxu1 %v5615_v46 }
 0x4e5   :  { %5060 = vmatprep.subr.bf16.mxu1 %v5616_v47 }
 0x4e8   :  { %5061 = vmatpush3.bf16.msra.mxu1 %v5616_v47 }
 0x4e9   :  { %5062 = vmatprep.subr.bf16.mxu1 %v5617_v51 }
 0x4ec   :  { %5063 = vmatpush3.bf16.msra.mxu1 %v5617_v51 }
 0x4ed   :  { %5068 = vmatprep.subr.bf16.mxu1 %v5618_v52 }
 0x4ef   :  { %5065 = vmatmul.mubr.bf16.vlgmr.msra.gmra.mrb[36].mxu1 %v1993_v60  ;;  %v5626_v60 = vld [vmem:[%s7117_s4 + $0x200] sm:$0xff]  }
 0x4f0   :  { %5069 = vmatpush3.bf16.msra.mxu1 %v5618_v52  ;;  %5084 = vmatprep.mubr.bf16.mxu1 %v2111_v12 }
 0x4f1   :  { %5070 = vmatprep.subr.bf16.mxu1 %v5619_v53 }
 0x4f4   :  { %5071 = vmatpush3.bf16.msra.mxu1 %v5619_v53 }
 0x4f5   :  { %5072 = vmatprep.subr.bf16.mxu1 %v5620_v54 }
 0x4f8   :  { %5073 = vmatpush3.bf16.msra.mxu1 %v5620_v54 }
 0x4f9   :  { %5074 = vmatprep.subr.bf16.mxu1 %v5621_v55 }
 0x4fc   :  { %5075 = vmatpush3.bf16.msra.mxu1 %v5621_v55  ;;  %v5775_v55 = vmov 0.0  }
 0x4fd   :  { %5076 = vmatprep.subr.bf16.mxu1 %v5622_v56 }
 0x500   :  { %5077 = vmatpush3.bf16.msra.mxu1 %v5622_v56  ;;  %v5663_v56 = vld [vmem:[%s7087_s16 + $0x40] sm:$0xff]  }
 0x501   :  { %5078 = vmatprep.subr.bf16.mxu1 %v5623_v57 }
 0x504   :  { %5079 = vmatpush3.bf16.msra.mxu1 %v5623_v57  ;;  %v5664_v57 = vld [vmem:[%s7087_s16 + $0x48] sm:$0xff]  }
 0x505   :  { %5080 = vmatprep.subr.bf16.mxu1 %v5624_v58 }
 0x508   :  { %5081 = vmatpush3.bf16.msra.mxu1 %v5624_v58  ;;  %v5665_v58 = vld [vmem:[%s7087_s16 + $0x50] sm:$0xff]  }
 0x509   :  { %5082 = vmatprep.subr.bf16.mxu1 %v5625_v59 }
 0x50c   :  { %5083 = vmatpush3.bf16.msra.mxu1 %v5625_v59  ;;  %v5666_v59 = vld [vmem:[%s7087_s16 + $0x58] sm:$0xff]  }
 0x50d   :  { %5088 = vmatprep.subr.bf16.mxu1 %v5626_v60 }
 0x50f   :  { %5085 = vmatmul.mubr.bf16.vlgmr.msra.gmra.mrb[36].mxu1 %v2112_v10 }
 0x510   :  { %5089 = vmatpush3.bf16.msra.mxu1 %v5626_v60  ;;  %5104 = vmatprep.mubr.bf16.mxu1 %v2230_v28  ;;  %v5650_v28 = vld [vmem:[%s7084_s13] sm:$0xff]  }
 0x511   :  { %5090 = vmatprep.subr.bf16.mxu1 %v5627_v61  ;;  %v5668_v60 = vld [vmem:[%s7087_s16 + $0x60] sm:$0xff]  }
 0x514   :  { %5091 = vmatpush3.bf16.msra.mxu1 %v5627_v61  ;;  %v5670_v61 = vld [vmem:[%s7087_s16 + $0x68] sm:$0xff]  }
 0x515   :  { %5092 = vmatprep.subr.bf16.mxu1 %v5628_v34 }
 0x518   :  { %5093 = vmatpush3.bf16.msra.mxu1 %v5628_v34  ;;  %v5672_v34 = vld [vmem:[%s7087_s16 + $0x70] sm:$0xff]  }
 0x519   :  { %5094 = vmatprep.subr.bf16.mxu1 %v5629_v62 }
 0x51c   :  { %5095 = vmatpush3.bf16.msra.mxu1 %v5629_v62  ;;  %v4353_v62 = vld [vmem:[%s7085_s14] ss:$0 sm:$0xff] }
 0x51d   :  { %5096 = vmatprep.subr.bf16.mxu1 %v5630_v63 }
 0x520   :  { %5097 = vmatpush3.bf16.msra.mxu1 %v5630_v63 }
 0x521   :  { %5098 = vmatprep.subr.bf16.mxu1 %v5631_v0 }
 0x524   :  { %5099 = vmatpush3.bf16.msra.mxu1 %v5631_v0 }
 0x525   :  { %5100 = vmatprep.subr.bf16.mxu1 %v5632_v1 }
 0x528   :  { %5101 = vmatpush3.bf16.msra.mxu1 %v5632_v1 }
 0x529   :  { %5102 = vmatprep.subr.bf16.mxu1 %v5633_v2 }
 0x52c   :  { %5103 = vmatpush3.bf16.msra.mxu1 %v5633_v2 }
 0x52d   :  { %5168 = vmatprep.subr.bf16.mxu1 %v5775_v55 }
 0x52f   :  { %5105 = vmatmul.mubr.bf16.vlgmr.msra.gmra.mrb[36].mxu1 %v2231_v25  ;;  %v5646_v25 = vld [vmem:[%s7082_s11 + $0x20] sm:$0xff]  }
 0x530   :  { %5172 = vmatprep.mubr.msk.bf16.mxu1 %vm5776_vm1, %v5775_v55 }
 0x602   :  { %v5106_v6 = vpop.f32.mrb[36].mxu1 }
 0x603   :  { %v2342_v7 = vadd.f32 %v5106_v6, %v4334_v5  ;;  %v2314_v8 = vpop.f32.mrb[37].mxu1 }
 0x604   :  { %v2340_v9 = vadd.f32 %v4334_v5, %v2314_v8  ;;  %v5107_v10 = vpop.f32.mrb[38].mxu1 }
 0x605   :  { %v2343_v11 = vadd.f32 %v5107_v10, %v4334_v5  ;;  %v2317_v12 = vpop.f32.mrb[39].mxu1  ;;  %v2346_v14 = vmax.f32 %v2342_v7, 0.0 }
 0x606   :  { %v2341_v13 = vadd.f32 %v4334_v5, %v2317_v12  ;;  %v2344_v16 = vmax.f32 %v2340_v9, 0.0 }
 0x607   :  { %v2347_v15 = vmax.f32 %v2343_v11, 0.0 }
 0x608   :  { %v2345_v17 = vmax.f32 %v2341_v13, 0.0  ;;  %v5658_v13 = vld [vmem:[%s7086_s15] sm:$0xff]  }
 0x609   :  { %v2365_v18 = vpack.c.bf16 %v2347_v15, %v2346_v14  ;;  %v5667_v14 = vld [vmem:[%s7087_s16 + $0x100] sm:$0xff]   ;;  %v5669_v15 = vld [vmem:[%s7087_s16 + $0x108] sm:$0xff]  }
 0x60a   :  { %v2364_v19 = vpack.c.bf16 %v2345_v17, %v2344_v16  ;;  %v5659_v16 = vld [vmem:[%s7086_s15 + $0x8] sm:$0xff]   ;;  %v5671_v17 = vld [vmem:[%s7087_s16 + $0x110] sm:$0xff]  }
 0x60c   :  { %5124 = vmatprep.mubr.bf16.mxu0 %v2364_v19  ;;  %v5660_v19 = vld [vmem:[%s7086_s15 + $0x10] sm:$0xff]  }
 0x60d   :  { %5125 = vmatmul.mubr.bf16.vlgmr.msra.gmra.mrb[72].mxu0 %v2365_v18  ;;  %v5673_v18 = vld [vmem:[%s7087_s16 + $0x118] sm:$0xff]  }
 0x60e   :  { %5129 = vmatpush3.bf16.msra.mxu0 %v5642_v4  ;;  %5144 = vmatprep.mubr.bf16.mxu0 %v6100_v24  ;;  %v5647_v24 = vld [vmem:[%s7082_s11 + $0x28] sm:$0xff]  }
 0x60f   :  { %5130 = vmatprep.subr.bf16.mxu0 %v5643_v20 }
 0x612   :  { %5131 = vmatpush3.bf16.msra.mxu0 %v5643_v20  ;;  %v5661_v20 = vld [vmem:[%s7086_s15 + $0x18] sm:$0xff]  }
 0x613   :  { %5132 = vmatprep.subr.bf16.mxu0 %v5644_v21 }
 0x616   :  { %5133 = vmatpush3.bf16.msra.mxu0 %v5644_v21  ;;  %v5662_v21 = vld [vmem:[%s7086_s15 + $0x20] ss:$0 sps:$4 sm:$0xff]  }
 0x617   :  { %5134 = vmatprep.subr.bf16.mxu0 %v5645_v22 }
 0x61a   :  { %5135 = vmatpush3.bf16.msra.mxu0 %v5645_v22  ;;  %v5674_v22 = vld [vmem:[%s7087_s16 + $0x78] sm:$0xff]  }
 0x61b   :  { %5136 = vmatprep.subr.bf16.mxu0 %v5646_v25 }
 0x61e   :  { %5137 = vmatpush3.bf16.msra.mxu0 %v5646_v25  ;;  %v5675_v25 = vld [vmem:[%s7087_s16 + $0x120] sm:$0xff]  }
 0x61f   :  { %5138 = vmatprep.subr.bf16.mxu0 %v5647_v24 }
 0x622   :  { %5139 = vmatpush3.bf16.msra.mxu0 %v5647_v24  ;;  %v5677_v24 = vld [vmem:[%s7087_s16 + $0x128] sm:$0xff]  }
 0x623   :  { %5140 = vmatprep.subr.bf16.mxu0 %v5648_v26 }
 0x626   :  { %5141 = vmatpush3.bf16.msra.mxu0 %v5648_v26  ;;  %v5679_v26 = vld [vmem:[%s7087_s16 + $0x130] sm:$0xff]  }
 0x627   :  { %5142 = vmatprep.subr.bf16.mxu0 %v5649_v27 }
 0x62a   :  { %5143 = vmatpush3.bf16.msra.mxu0 %v5649_v27  ;;  %v5681_v27 = vld [vmem:[%s7087_s16 + $0x138] sm:$0xff]  }
 0x62b   :  { %5148 = vmatprep.subr.bf16.mxu0 %v5650_v28 }
 0x62d   :  { %5145 = vmatmul.mubr.bf16.vlgmr.msra.gmra.mrb[72].mxu0 %v6098_v23  ;;  %v5655_v23 = vld [vmem:[%s7084_s13 + $0x28] sm:$0xff]  }
 0x62e   :  { %5149 = vmatpush3.bf16.msra.mxu0 %v5650_v28 }
 0x62f   :  { %5150 = vmatprep.subr.bf16.mxu0 %v5651_v29 }
 0x632   :  { %5151 = vmatpush3.bf16.msra.mxu0 %v5651_v29 }
 0x633   :  { %5152 = vmatprep.subr.bf16.mxu0 %v5652_v30 }
 0x636   :  { %5153 = vmatpush3.bf16.msra.mxu0 %v5652_v30 }
 0x637   :  { %5154 = vmatprep.subr.bf16.mxu0 %v5653_v31 }
 0x63a   :  { %5155 = vmatpush3.bf16.msra.mxu0 %v5653_v31  ;;  %v5676_v31 = vld [vmem:[%s7087_s16] sm:$0xff]  }
 0x63b   :  { %5156 = vmatprep.subr.bf16.mxu0 %v5654_v32 }
 0x63e   :  { %5157 = vmatpush3.bf16.msra.mxu0 %v5654_v32 }
 0x63f   :  { %5158 = vmatprep.subr.bf16.mxu0 %v5655_v23 }
 0x642   :  { %5159 = vmatpush3.bf16.msra.mxu0 %v5655_v23 }
 0x643   :  { %5160 = vmatprep.subr.bf16.mxu0 %v5656_v33 }
 0x646   :  { %5161 = vmatpush3.bf16.msra.mxu0 %v5656_v33  ;;  %v5678_v33 = vld [vmem:[%s7087_s16 + $0x8] sm:$0xff]  }
 0x647   :  { %5162 = vmatprep.subr.bf16.mxu0 %v5657_v35 }
 0x64a   :  { %5163 = vmatpush3.bf16.msra.mxu0 %v5657_v35 }
 0x64b   :  { %5192 = vmatprep.subr.bf16.mxu0 %v5775_v55 }
 0x700   :  { %v5146_v39 = vpop.f32.mrb[72].mxu0 }
 0x701   :  { %v5425_v40 = vadd.f32 %v5146_v39, %v4335_v36  ;;  %v2575_v41 = vpop.f32.mrb[73].mxu0 }
 0x702   :  { %v5427_v42 = vadd.f32 %v4335_v36, %v2575_v41  ;;  %v5147_v44 = vpop.f32.mrb[74].mxu0 }
 0x703   :  { %v5426_v45 = vadd.f32 %v5425_v40, %v4344_v37  ;;  %v5430_v48 = vadd.f32 %v5431_v38, %v5147_v44  ;;  %v2578_v49 = vpop.f32.mrb[75].mxu0  ;;  %v5682_v40 = vld [vmem:[%s7087_s16 + $0x18] sm:$0xff]  }
 0x704   :  { %v5428_v50 = vadd.f32 %v5427_v42, %v4344_v37  ;;  %v5432_v43 = vadd.f32 %v5431_v38, %v2578_v49  ;;  %v5680_v37 = vld [vmem:[%s7087_s16 + $0x10] sm:$0xff]   ;;  %v5683_v42 = vld [vmem:[%s7087_s16 + $0x180] sm:$0xff]  }
 0x705   :  { %v2596_v46 = vmax.f32 %v5426_v45, 0.0  ;;  %v2597_v47 = vmax.f32 %v5430_v48, 0.0  ;;  %v5684_v48 = vld [vmem:[%s7087_s16 + $0x20] sm:$0xff]  }
 0x706   :  { %v2594_v51 = vmax.f32 %v5428_v50, 0.0  ;;  %v2595_v52 = vmax.f32 %v5432_v43, 0.0  ;;  %v5685_v43 = vld [vmem:[%s7087_s16 + $0x188] sm:$0xff]  }
 0x707   :  { %v6595_v53 = vpack.c.bf16 %v2597_v47, %v2596_v46  ;;  %v5686_v46 = vld [vmem:[%s7087_s16 + $0x28] sm:$0xff]   ;;  %v5687_v47 = vld [vmem:[%s7087_s16 + $0x190] sm:$0xff]  }
 0x708   :  { %v6597_v54 = vpack.c.bf16 %v2595_v52, %v2594_v51 }
 0x70a   :  { %5164 = vmatprep.mubr.bf16.mxu0 %v6597_v54 }
 0x70b   :  { %5165 = vmatmul.mubr.bf16.vlgmr.msra.gmra.mrb[76].mxu0 %v6595_v53 }
 0x70c   :  { %5208 = vmatprep.mubr.msk.bf16.mxu0 %vm5776_vm1, %v5775_v55  ;;  %5193 = vmatpush3.bf16.msra.mxu0 %v5663_v56  ;;  %v5688_v56 = vld [vmem:[%s7087_s16 + $0x30] sm:$0xff]  }
 0x70d   :  { %5194 = vmatprep.subr.bf16.mxu0 %v5775_v55 }
 0x710   :  { %5195 = vmatpush3.bf16.msra.mxu0 %v5664_v57 }
 0x711   :  { %5196 = vmatprep.subr.bf16.mxu0 %v5775_v55 }
 0x714   :  { %5197 = vmatpush3.bf16.msra.mxu0 %v5665_v58 }
 0x715   :  { %5198 = vmatprep.subr.bf16.mxu0 %v5775_v55 }
 0x718   :  { %5199 = vmatpush3.bf16.msra.mxu0 %v5666_v59  ;;  %v5689_v59 = vld [vmem:[%s7087_s16 + $0x198] sm:$0xff]  }
 0x719   :  { %5200 = vmatprep.subr.bf16.mxu0 %v5775_v55 }
 0x71c   :  { %5201 = vmatpush3.bf16.msra.mxu0 %v5668_v60  ;;  %v5690_v60 = vld [vmem:[%s7087_s16 + $0x38] sm:$0xff]  }
 0x71d   :  { %5202 = vmatprep.subr.bf16.mxu0 %v5775_v55 }
 0x720   :  { %5203 = vmatpush3.bf16.msra.mxu0 %v5670_v61  ;;  %v5691_v61 = vld [vmem:[%s7087_s16 + $0x1a0] sm:$0xff]  }
 0x721   :  { %5204 = vmatprep.subr.bf16.mxu0 %v5775_v55 }
 0x724   :  { %5205 = vmatpush3.bf16.msra.mxu0 %v5672_v34 }
 0x725   :  { %5206 = vmatprep.subr.bf16.mxu0 %v5775_v55 }
 0x728   :  { %5207 = vmatpush3.bf16.msra.mxu0 %v5674_v22  ;;  %v5710_v22 = vld [vmem:[%s7087_s16 + $0xc8] sm:$0xff]  }
 0x729   :  { %5212 = vmatprep.subr.bf16.mxu0 %v5775_v55 }
 0x7de   :  { %v5166_v63 = vpop.f32.mrb[76].mxu0 }
 0x7df   :  { %v2714_v0 = vadd.f32 %v5166_v63, %v4353_v62  ;;  %v2705_v1 = vpop.f32.mrb[77].mxu0  ;;  %v5692_v63 = vld [vmem:[%s7087_s16 + $0x80] sm:$0xff]  }
 0x7e0   :  { %v2706_v2 = vadd.f32 %v4353_v62, %v2705_v1  ;;  %v5167_v3 = vpop.f32.mrb[78].mxu0 }
 0x7e1   :  { %v2717_v4 = vadd.f32 %v5167_v3, %v4353_v62  ;;  %v2708_v5 = vpop.f32.mrb[79].mxu0  ;;  %v2722_v7 = vmax.f32 %v2714_v0, 0.0  ;;  %v5693_v3 = vld [vmem:[%s7087_s16 + $0x1a8] sm:$0xff]  }
 0x7e2   :  { %v2709_v6 = vadd.f32 %v4353_v62, %v2708_v5  ;;  %v2720_v9 = vmax.f32 %v2706_v2, 0.0  ;;  %v5695_v5 = vld [vmem:[%s7087_s16 + $0x1b0] sm:$0xff]  }
 0x7e3   :  { %v2723_v8 = vmax.f32 %v2717_v4, 0.0  ;;  %v5694_v4 = vld [vmem:[%s7087_s16 + $0x88] sm:$0xff]  }
 0x7e4   :  { %v2721_v10 = vmax.f32 %v2709_v6, 0.0  ;;  %v5696_v6 = vld [vmem:[%s7087_s16 + $0x90] sm:$0xff]  }
 0x7e5   :  { %v2734_v11 = vpack.c.bf16 %v2723_v8, %v2722_v7  ;;  %v5697_v7 = vld [vmem:[%s7087_s16 + $0x1b8] sm:$0xff]  }
 0x7e6   :  { %v2733_v12 = vpack.c.bf16 %v2721_v10, %v2720_v9  ;;  %v5698_v8 = vld [vmem:[%s7087_s16 + $0x98] sm:$0xff]   ;;  %v5699_v10 = vld [vmem:[%s7087_s16 + $0x200] sm:$0xff]  }
 0x7e8   :  { %5169 = vmatpush3.bf16.msra.mxu1 %v2733_v12  ;;  %v5701_v12 = vld [vmem:[%s7087_s16 + $0x208] sm:$0xff]  }
 0x7e9   :  { %5170 = vmatprep.subr.bf16.mxu1 %v5775_v55 }
 0x7ec   :  { %5171 = vmatpush3.bf16.msra.mxu1 %v2734_v11  ;;  %v5700_v11 = vld [vmem:[%s7087_s16 + $0xa0] sm:$0xff]  }
 0x7ed   :  { %5272 = vmatprep.subr.bf16.mxu1 %v5775_v55 }
 0x7ef   :  { %5173 = vmatmul.mubr.msk.bf16.vlgmr.msra.gmra.mrb[40].mxu1 %vm1038_vm0, %v5658_v13  ;;  %v5702_v13 = vld [vmem:[%s7087_s16 + $0xa8] sm:$0xff]  }
 0x7f0   :  { %5176 = vmatprep.mubr.msk.bf16.mxu1 %vm5776_vm1, %v5775_v55  ;;  %5273 = vmatpush3.bf16.msra.mxu1 %v5667_v14  ;;  %v5703_v14 = vld [vmem:[%s7087_s16 + $0x210] sm:$0xff]  }
 0x7f1   :  { %5274 = vmatprep.subr.bf16.mxu1 %v5775_v55 }
 0x7f4   :  { %5275 = vmatpush3.bf16.msra.mxu1 %v5669_v15  ;;  %v5704_v15 = vld [vmem:[%s7087_s16 + $0xb0] sm:$0xff]  }
 0x7f5   :  { %5276 = vmatprep.subr.bf16.mxu1 %v5775_v55 }
 0x7f7   :  { %5177 = vmatmul.mubr.msk.bf16.gmra.mrb[44].mxu1 %vm1038_vm0, %v5659_v16  ;;  %v5705_v16 = vld [vmem:[%s7087_s16 + $0x218] sm:$0xff]  }
 0x7f8   :  { %5180 = vmatprep.mubr.msk.bf16.mxu1 %vm5776_vm1, %v5775_v55  ;;  %5277 = vmatpush3.bf16.msra.mxu1 %v5671_v17  ;;  %v5706_v17 = vld [vmem:[%s7087_s16 + $0xb8] sm:$0xff]  }
 0x7f9   :  { %5278 = vmatprep.subr.bf16.mxu1 %v5775_v55 }
 0x7fc   :  { %5279 = vmatpush3.bf16.msra.mxu1 %v5673_v18  ;;  %v5707_v18 = vld [vmem:[%s7087_s16 + $0x220] sm:$0xff]  }
 0x7fd   :  { %5280 = vmatprep.subr.bf16.mxu1 %v5775_v55 }
 0x7ff   :  { %5181 = vmatmul.mubr.msk.bf16.gmra.mrb[48].mxu1 %vm1038_vm0, %v5660_v19 }
 0x800   :  { %5184 = vmatprep.mubr.msk.bf16.mxu1 %vm5776_vm1, %v5775_v55  ;;  %5281 = vmatpush3.bf16.msra.mxu1 %v5675_v25  ;;  %v5711_v25 = vld [vmem:[%s7087_s16 + $0x230] sm:$0xff]  }
 0x801   :  { %5282 = vmatprep.subr.bf16.mxu1 %v5775_v55 }
 0x804   :  { %5283 = vmatpush3.bf16.msra.mxu1 %v5677_v24  ;;  %v5712_v24 = vld [vmem:[%s7087_s16 + $0xd0] sm:$0xff]  }
 0x805   :  { %5284 = vmatprep.subr.bf16.mxu1 %v5775_v55 }
 0x807   :  { %5185 = vmatmul.mubr.msk.bf16.gmra.mrb[52].mxu1 %vm1038_vm0, %v5661_v20  ;;  %v5708_v20 = vld [vmem:[%s7087_s16 + $0xc0] sm:$0xff]  }
 0x808   :  { %5188 = vmatprep.mubr.msk.bf16.mxu1 %vm5776_vm1, %v5775_v55  ;;  %5285 = vmatpush3.bf16.msra.mxu1 %v5679_v26  ;;  %v5713_v26 = vld [vmem:[%s7087_s16 + $0x238] sm:$0xff]  }
 0x809   :  { %5286 = vmatprep.subr.bf16.mxu1 %v5775_v55 }
 0x80c   :  { %5287 = vmatpush3.bf16.msra.mxu1 %v5681_v27  ;;  %v5714_v27 = vld [vmem:[%s7087_s16 + $0xd8] sm:$0xff]  }
 0x80d   :  { %5312 = vmatprep.subr.bf16.mxu1 %v5775_v55 }
 0x80f   :  { %5189 = vmatmul.mubr.msk.bf16.gmra.mrb[56].mxu1 %vm1038_vm0, %v5662_v21  ;;  %v5709_v21 = vld [vmem:[%s7087_s16 + $0x228] sm:$0xff]  }
 0x810   :  { %5288 = vmatprep.mubr.msk.bf16.mxu1 %vm5776_vm1, %v5775_v55 }
 0x8c2   :  { %v6706_v28 = vpop.f32.mrb[40].mxu1 }
 0x8c3   :  { %v5174_v29 = vpop.f32.mrb[41].mxu1  ;;  %v2861_v1 = vpack.c.bf16 %v6706_v28, %v6706_v28 }
 0x8c4   :  { %v2810_v30 = vpop.f32.mrb[42].mxu1  ;;  %v5715_v29 = vld [vmem:[%s7087_s16 + $0xe0] sm:$0xff]  }
 0x8c5   :  { %v2878_v32 = vpack.c.bf16 %v2810_v30, %v2810_v30  ;;  %v5175_v23 = vpop.f32.mrb[43].mxu1  ;;  %v5716_v30 = vld [vmem:[%s7087_s16 + $0xe8] sm:$0xff]  }
 0x8c7   :  { %5209 = vmatmul.mubr.bf16.vlgmr.msra.gmra.mrb[80].mxu0 %v2878_v32  ;;  %v5719_v32 = vld [vmem:[%s7087_s16 + $0x140] sm:$0xff]  }
 0x8c8   :  { %5213 = vmatpush3.bf16.msra.mxu0 %v5676_v31  ;;  %5228 = vmatprep.mubr.msk.bf16.mxu0 %vm5776_vm1, %v5775_v55  ;;  %v3918_v31 = vld [vmem:[%s7093_s22] sm:$0xf] }
 0x8c9   :  { %5214 = vmatprep.subr.bf16.mxu0 %v5775_v55 }
 0x8ca   :  { %v6717_v35 = vpop.f32.mrb[44].mxu1 }
 0x8cb   :  { %v5178_v36 = vpop.f32.mrb[45].mxu1  ;;  %v3071_v19 = vpack.c.bf16 %v6717_v35, %v6717_v35  ;;  %v5721_v35 = vld [vmem:[%s7087_s16 + $0x150] sm:$0xff]  }
 0x8cc   :  { %5215 = vmatpush3.bf16.msra.mxu0 %v5678_v33  ;;  %v6722_v38 = vpop.f32.mrb[46].mxu1  ;;  %v5720_v33 = vld [vmem:[%s7087_s16 + $0x148] sm:$0xff]   ;;  %v5722_v36 = vld [vmem:[%s7087_s16 + $0x158] sm:$0xff]  }
 0x8cd   :  { %5216 = vmatprep.subr.bf16.mxu0 %v5775_v55  ;;  %v5179_v39 = vpop.f32.mrb[47].mxu1  ;;  %v3177_v23 = vpack.c.bf16 %v6722_v38, %v6722_v38  ;;  %v5724_v38 = vld [vmem:[%s7087_s16 + $0x168] sm:$0xff]  }
 0x8ce   :  { %v5725_v39 = vld [vmem:[%s7087_s16 + $0x170] sm:$0xff]  }
 0x8d0   :  { %5217 = vmatpush3.bf16.msra.mxu0 %v5680_v37  ;;  %v5723_v37 = vld [vmem:[%s7087_s16 + $0x160] sm:$0xff]  }
 0x8d1   :  { %5218 = vmatprep.subr.bf16.mxu0 %v5775_v55 }
 0x8d2   :  { %v2823_v41 = vpop.f32.mrb[48].mxu1 }
 0x8d3   :  { %v3283_v44 = vpack.c.bf16 %v2823_v41, %v2823_v41  ;;  %v5182_v45 = vpop.f32.mrb[49].mxu1  ;;  %v5727_v41 = vld [vmem:[%s7087_s16 + $0x1c0] sm:$0xff]  }
 0x8d4   :  { %5219 = vmatpush3.bf16.msra.mxu0 %v5682_v40  ;;  %v6735_v49 = vpop.f32.mrb[50].mxu1  ;;  %v5726_v40 = vld [vmem:[%s7087_s16 + $0x178] sm:$0xff]   ;;  %v5729_v45 = vld [vmem:[%s7087_s16 + $0x1d0] sm:$0xff]  }
 0x8d5   :  { %5289 = vmatmul.mubr.bf16.vlgmr.msra.gmra.mrb[60].mxu1 %v3283_v44  ;;  %5220 = vmatprep.subr.bf16.mxu0 %v5775_v55  ;;  %v5183_v50 = vpop.f32.mrb[51].mxu1  ;;  %v5728_v44 = vld [vmem:[%s7087_s16 + $0x1c8] sm:$0xff]  }
 0x8d6   :  { %5313 = vmatpush3.bf16.msra.mxu1 %v5683_v42  ;;  %5328 = vmatprep.mubr.msk.bf16.mxu1 %vm5776_vm1, %v5775_v55  ;;  %v3389_v42 = vpack.c.bf16 %v6735_v49, %v6735_v49  ;;  %v5731_v49 = vld [vmem:[%s7087_s16 + $0x1e0] sm:$0xff]   ;;  %v5732_v50 = vld [vmem:[%s7087_s16 + $0x1e8] sm:$0xff]  }
 0x8d7   :  { %5314 = vmatprep.subr.bf16.mxu1 %v5775_v55 }
 0x8d8   :  { %5221 = vmatpush3.bf16.msra.mxu0 %v5684_v48  ;;  %v5730_v48 = vld [vmem:[%s7087_s16 + $0x1d8] sm:$0xff]  }
 0x8d9   :  { %5222 = vmatprep.subr.bf16.mxu0 %v5775_v55 }
 0x8da   :  { %5315 = vmatpush3.bf16.msra.mxu1 %v5685_v43  ;;  %v2831_v51 = vpop.f32.mrb[52].mxu1  ;;  %v5733_v43 = vld [vmem:[%s7087_s16 + $0x1f0] sm:$0xff]  }
 0x8db   :  { %5316 = vmatprep.subr.bf16.mxu1 %v5775_v55  ;;  %v5186_v52 = vpop.f32.mrb[53].mxu1  ;;  %v3495_v9 = vpack.c.bf16 %v2831_v51, %v2831_v51 }
 0x8dc   :  { %5223 = vmatpush3.bf16.msra.mxu0 %v5686_v46  ;;  %v6755_v57 = vpop.f32.mrb[54].mxu1  ;;  %v5734_v46 = vld [vmem:[%s7087_s16 + $0x1f8] sm:$0xff]  }
 0x8dd   :  { %5224 = vmatprep.subr.bf16.mxu0 %v5775_v55  ;;  %v5187_v58 = vpop.f32.mrb[55].mxu1 }
 0x8de   :  { %5317 = vmatpush3.bf16.msra.mxu1 %v5687_v47  ;;  %v3601_v47 = vpack.c.bf16 %v6755_v57, %v6755_v57  ;;  %v5737_v57 = vld [vmem:[%s7089_s18 + $0x10] sm:$0xff]  }
 0x8df   :  { %5318 = vmatprep.subr.bf16.mxu1 %v5775_v55 }
 0x8e0   :  { %5225 = vmatpush3.bf16.msra.mxu0 %v5688_v56 }
 0x8e1   :  { %5226 = vmatprep.subr.bf16.mxu0 %v5775_v55 }
 0x8e2   :  { %5319 = vmatpush3.bf16.msra.mxu1 %v5689_v59  ;;  %v6769_v34 = vpop.f32.mrb[56].mxu1  ;;  %v5735_v59 = vld [vmem:[%s7089_s18] sm:$0xff]  }
 0x8e3   :  { %5320 = vmatprep.subr.bf16.mxu1 %v5775_v55  ;;  %v5190_v62 = vpop.f32.mrb[57].mxu1  ;;  %v3707_v28 = vpack.c.bf16 %v6769_v34, %v6769_v34 }
 0x8e4   :  { %5227 = vmatpush3.bf16.msra.mxu0 %v5690_v60  ;;  %v2842_v0 = vpop.f32.mrb[58].mxu1  ;;  %v5736_v60 = vld [vmem:[%s7089_s18 + $0x8] sm:$0xff]  }
 0x8e5   :  { %5232 = vmatprep.subr.bf16.mxu0 %v5775_v55  ;;  %v5191_v2 = vpop.f32.mrb[59].mxu1 }
 0x8e6   :  { %5321 = vmatpush3.bf16.msra.mxu1 %v5691_v61  ;;  %v5738_v61 = vld [vmem:[%s7089_s18 + $0x18] sm:$0xff]   ;;  %v5740_v2 = vld [vmem:[%s7089_s18 + $0x28] sm:$0xff]  }
 0x8e7   :  { %5229 = vmatmul.mubr.bf16.vlgmr.msra.gmra.mrb[84].mxu0 %v2861_v1  ;;  %5322 = vmatprep.subr.bf16.mxu1 %v5775_v55  ;;  %v5739_v1 = vld [vmem:[%s7089_s18 + $0x20] sm:$0xff]  }
 0x8e8   :  { %5233 = vmatpush3.bf16.msra.mxu0 %v5692_v63  ;;  %5248 = vmatprep.mubr.msk.bf16.mxu0 %vm5776_vm1, %v5775_v55 }
 0x8e9   :  { %5234 = vmatprep.subr.bf16.mxu0 %v5775_v55 }
 0x8ea   :  { %5323 = vmatpush3.bf16.msra.mxu1 %v5693_v3 }
 0x8eb   :  { %5324 = vmatprep.subr.bf16.mxu1 %v5775_v55 }
 0x8ec   :  { %5235 = vmatpush3.bf16.msra.mxu0 %v5694_v4 }
 0x8ed   :  { %5236 = vmatprep.subr.bf16.mxu0 %v5775_v55 }
 0x8ee   :  { %5325 = vmatpush3.bf16.msra.mxu1 %v5695_v5 }
 0x8ef   :  { %5326 = vmatprep.subr.bf16.mxu1 %v5775_v55 }
 0x8f0   :  { %5237 = vmatpush3.bf16.msra.mxu0 %v5696_v6  ;;  %v5741_v6 = vld [vmem:[%s7089_s18 + $0x30] sm:$0xff]  }
 0x8f1   :  { %5238 = vmatprep.subr.bf16.mxu0 %v5775_v55 }
 0x8f2   :  { %5327 = vmatpush3.bf16.msra.mxu1 %v5697_v7 }
 0x8f3   :  { %5352 = vmatprep.subr.bf16.mxu1 %v5775_v55 }
 0x8f4   :  { %5239 = vmatpush3.bf16.msra.mxu0 %v5698_v8 }
 0x8f5   :  { %5329 = vmatmul.mubr.bf16.vlgmr.msra.gmra.mrb[64].mxu1 %v3495_v9  ;;  %5240 = vmatprep.subr.bf16.mxu0 %v5775_v55  ;;  %v5742_v9 = vld [vmem:[%s7089_s18 + $0x38] sm:$0xff]  }
 0x8f6   :  { %5353 = vmatpush3.bf16.msra.mxu1 %v5699_v10  ;;  %5368 = vmatprep.mubr.msk.bf16.mxu1 %vm5776_vm1, %v5775_v55 }
 0x8f7   :  { %5354 = vmatprep.subr.bf16.mxu1 %v5775_v55 }
 0x8f8   :  { %5241 = vmatpush3.bf16.msra.mxu0 %v5700_v11 }
 0x8f9   :  { %5242 = vmatprep.subr.bf16.mxu0 %v5775_v55 }
 0x8fa   :  { %5355 = vmatpush3.bf16.msra.mxu1 %v5701_v12 }
 0x8fb   :  { %5356 = vmatprep.subr.bf16.mxu1 %v5775_v55 }
 0x8fc   :  { %5243 = vmatpush3.bf16.msra.mxu0 %v5702_v13 }
 0x8fd   :  { %5244 = vmatprep.subr.bf16.mxu0 %v5775_v55 }
 0x8fe   :  { %5357 = vmatpush3.bf16.msra.mxu1 %v5703_v14 }
 0x8ff   :  { %5358 = vmatprep.subr.bf16.mxu1 %v5775_v55 }
 0x900   :  { %5245 = vmatpush3.bf16.msra.mxu0 %v5704_v15 }
 0x901   :  { %5246 = vmatprep.subr.bf16.mxu0 %v5775_v55 }
 0x902   :  { %5359 = vmatpush3.bf16.msra.mxu1 %v5705_v16 }
 0x903   :  { %5360 = vmatprep.subr.bf16.mxu1 %v5775_v55 }
 0x904   :  { %5247 = vmatpush3.bf16.msra.mxu0 %v5706_v17 }
 0x905   :  { %5252 = vmatprep.subr.bf16.mxu0 %v5775_v55 }
 0x906   :  { %5361 = vmatpush3.bf16.msra.mxu1 %v5707_v18 }
 0x907   :  { %5249 = vmatmul.mubr.bf16.vlgmr.msra.gmra.mrb[88].mxu0 %v3071_v19  ;;  %5362 = vmatprep.subr.bf16.mxu1 %v5775_v55 }
 0x908   :  { %5253 = vmatpush3.bf16.msra.mxu0 %v5708_v20  ;;  %5268 = vmatprep.mubr.msk.bf16.mxu0 %vm5776_vm1, %v5775_v55 }
 0x909   :  { %5254 = vmatprep.subr.bf16.mxu0 %v5775_v55 }
 0x90a   :  { %5363 = vmatpush3.bf16.msra.mxu1 %v5709_v21 }
 0x90b   :  { %5364 = vmatprep.subr.bf16.mxu1 %v5775_v55 }
 0x90c   :  { %5255 = vmatpush3.bf16.msra.mxu0 %v5710_v22 }
 0x90d   :  { %5256 = vmatprep.subr.bf16.mxu0 %v5775_v55 }
 0x90e   :  { %5365 = vmatpush3.bf16.msra.mxu1 %v5711_v25 }
 0x90f   :  { %5366 = vmatprep.subr.bf16.mxu1 %v5775_v55 }
 0x910   :  { %5257 = vmatpush3.bf16.msra.mxu0 %v5712_v24 }
 0x911   :  { %5258 = vmatprep.subr.bf16.mxu0 %v5775_v55 }
 0x912   :  { %5367 = vmatpush3.bf16.msra.mxu1 %v5713_v26 }
 0x913   :  { %5392 = vmatprep.subr.bf16.mxu1 %v5775_v55 }
 0x914   :  { %5259 = vmatpush3.bf16.msra.mxu0 %v5714_v27 }
 0x915   :  { %5369 = vmatmul.mubr.bf16.vlgmr.msra.gmra.mrb[68].mxu1 %v3707_v28  ;;  %5260 = vmatprep.subr.bf16.mxu0 %v5775_v55 }
 0x916   :  { %5393 = vmatpush3.bf16.msra.mxu1 %v6597_v54  ;;  %5396 = vmatprep.mubr.msk.bf16.mxu1 %vm5776_vm1, %v5775_v55  ;;  %v5717_v54 = vld [vmem:[%s7087_s16 + $0xf0] sm:$0xff]  }
 0x917   :  { %5394 = vmatprep.subr.bf16.mxu1 %v5775_v55 }
 0x918   :  { %5261 = vmatpush3.bf16.msra.mxu0 %v5715_v29 }
 0x919   :  { %5262 = vmatprep.subr.bf16.mxu0 %v5775_v55 }
 0x91a   :  { %5395 = vmatpush3.bf16.msra.mxu1 %v6595_v53  ;;  %v5718_v53 = vld [vmem:[%s7087_s16 + $0xf8] sm:$0xff]  }
 0x91b   :  { %5420 = vmatprep.subr.mxu1 %v5775_v55 }
 0x91c   :  { %5263 = vmatpush3.bf16.msra.mxu0 %v5716_v30 }
 0x91d   :  { %5264 = vmatprep.subr.bf16.mxu0 %v5775_v55  ;;  %5397 = vmatmul.mubr.msk.bf16.vlgmr.msra.gmra.mrb[72].mxu1 %vm1038_vm0, %v3918_v31 }
 0x91e   :  { %5422 = vmatprep.mubr.msk.f32.mxu1 %vm5776_vm1, %v5775_v55 }
 0x920   :  { %5265 = vmatpush3.bf16.msra.mxu0 %v5717_v54 }
 0x921   :  { %5266 = vmatprep.subr.bf16.mxu0 %v5775_v55 }
 0x924   :  { %5267 = vmatpush3.bf16.msra.mxu0 %v5718_v53 }
 0x925   :  { %5292 = vmatprep.subr.bf16.mxu0 %v5775_v55 }
 0x927   :  { %5269 = vmatmul.mubr.bf16.vlgmr.msra.gmra.mrb[92].mxu0 %v3177_v23 }
 0x928   :  { %5293 = vmatpush3.bf16.msra.mxu0 %v5719_v32  ;;  %5308 = vmatprep.mubr.msk.bf16.mxu0 %vm5776_vm1, %v5775_v55 }
 0x929   :  { %5294 = vmatprep.subr.bf16.mxu0 %v5775_v55 }
 0x92c   :  { %5295 = vmatpush3.bf16.msra.mxu0 %v5720_v33 }
 0x92d   :  { %5296 = vmatprep.subr.bf16.mxu0 %v5775_v55 }
 0x930   :  { %5297 = vmatpush3.bf16.msra.mxu0 %v5721_v35 }
 0x931   :  { %5298 = vmatprep.subr.bf16.mxu0 %v5775_v55 }
 0x934   :  { %5299 = vmatpush3.bf16.msra.mxu0 %v5722_v36 }
 0x935   :  { %5300 = vmatprep.subr.bf16.mxu0 %v5775_v55 }
 0x938   :  { %5301 = vmatpush3.bf16.msra.mxu0 %v5723_v37 }
 0x939   :  { %5302 = vmatprep.subr.bf16.mxu0 %v5775_v55 }
 0x93c   :  { %5303 = vmatpush3.bf16.msra.mxu0 %v5724_v38 }
 0x93d   :  { %5304 = vmatprep.subr.bf16.mxu0 %v5775_v55 }
 0x940   :  { %5305 = vmatpush3.bf16.msra.mxu0 %v5725_v39 }
 0x941   :  { %5306 = vmatprep.subr.bf16.mxu0 %v5775_v55 }
 0x944   :  { %5307 = vmatpush3.bf16.msra.mxu0 %v5726_v40 }
 0x945   :  { %5332 = vmatprep.subr.bf16.mxu0 %v5775_v55 }
 0x947   :  { %5309 = vmatmul.mubr.bf16.vlgmr.msra.gmra.mrb[96].mxu0 %v3389_v42 }
 0x948   :  { %5333 = vmatpush3.bf16.msra.mxu0 %v5727_v41  ;;  %5348 = vmatprep.mubr.msk.bf16.mxu0 %vm5776_vm1, %v5775_v55  ;;  %v4444_v41 = vld [vmem:[%s7088_s17] ss:$0 sm:$0xff] }
 0x949   :  { %5334 = vmatprep.subr.bf16.mxu0 %v5775_v55 }
 0x94c   :  { %5335 = vmatpush3.bf16.msra.mxu0 %v5728_v44 }
 0x94d   :  { %5336 = vmatprep.subr.bf16.mxu0 %v5775_v55 }
 0x950   :  { %5337 = vmatpush3.bf16.msra.mxu0 %v5729_v45 }
 0x951   :  { %5338 = vmatprep.subr.bf16.mxu0 %v5775_v55 }
 0x954   :  { %5339 = vmatpush3.bf16.msra.mxu0 %v5730_v48 }
 0x955   :  { %5340 = vmatprep.subr.bf16.mxu0 %v5775_v55 }
 0x958   :  { %5341 = vmatpush3.bf16.msra.mxu0 %v5731_v49 }
 0x959   :  { %5342 = vmatprep.subr.bf16.mxu0 %v5775_v55 }
 0x95c   :  { %5343 = vmatpush3.bf16.msra.mxu0 %v5732_v50  ;;  %v5743_v50 = vld [vmem:[%s7091_s20] sm:$0xff]  }
 0x95d   :  { %5344 = vmatprep.subr.bf16.mxu0 %v5775_v55 }
 0x960   :  { %5345 = vmatpush3.bf16.msra.mxu0 %v5733_v43 }
 0x961   :  { %5346 = vmatprep.subr.bf16.mxu0 %v5775_v55 }
 0x964   :  { %5347 = vmatpush3.bf16.msra.mxu0 %v5734_v46  ;;  %v5744_v46 = vld [vmem:[%s7091_s20 + $0x8] sm:$0xff]  }
 0x965   :  { %5372 = vmatprep.subr.bf16.mxu0 %v5775_v55 }
 0x967   :  { %5349 = vmatmul.mubr.bf16.vlgmr.msra.gmra.mrb[100].mxu0 %v3601_v47  ;;  %v5745_v47 = vld [vmem:[%s7091_s20 + $0x10] sm:$0xff]  }
 0x968   :  { %5388 = vmatprep.mubr.msk.bf16.mxu0 %vm5776_vm1, %v5775_v55  ;;  %5373 = vmatpush3.bf16.msra.mxu0 %v5735_v59  ;;  %v5750_v59 = vld [vmem:[%s7091_s20 + $0x38] sm:$0xff]  }
 0x969   :  { %5374 = vmatprep.subr.bf16.mxu0 %v5775_v55 }
 0x96c   :  { %5375 = vmatpush3.bf16.msra.mxu0 %v5736_v60 }
 0x96d   :  { %5376 = vmatprep.subr.bf16.mxu0 %v5775_v55 }
 0x970   :  { %5377 = vmatpush3.bf16.msra.mxu0 %v5737_v57  ;;  %v4445_v57 = vld [vmem:[%s7090_s19] ss:$0 sm:$0xff]  ;;  %s4158_s19 = sshll.u32 %s5777_s28, 4  ;;  %s4159_s19 = int_to_ptr.vmem [resolvable:$true] %s4158_s19 }
 0x971   :  { %5378 = vmatprep.subr.bf16.mxu0 %v5775_v55  ;;  %p5756_p1 = scmp.lt.s32.totalorder %s4159_s19, %s4159_s19 }
 0x974   :  { %5379 = vmatpush3.bf16.msra.mxu0 %v5738_v61  ;;  %v4455_v61 = vld [vmem:[%s7092_s21] ss:$0 sm:$0xff]  ;;  %s5751_s21 = scalar_lea.vmem %s4159_s19, 32 }
 0x975   :  { %5380 = vmatprep.subr.bf16.mxu0 %v5775_v55  ;;  %p5752_p0 = scmp.ne.s32.totalorder %s4159_s19, %s5751_s21  ;;  %p5757_p2 = scmp.lt.s32.totalorder %s5751_s21, %s5751_s21 }
 0x977   :  { %p5758_p3 = por %p5757_p2, %p5756_p1 }
 0x978   :  { %5381 = vmatpush3.bf16.msra.mxu0 %v5739_v1 }
 0x979   :  { %5382 = vmatprep.subr.bf16.mxu0 %v5775_v55  ;;  %p5759_p4 = pnand %p5758_p3, %p5752_p0 }
 0x97c   :  { %5383 = vmatpush3.bf16.msra.mxu0 %v5740_v2 }
 0x97d   :  { %5384 = vmatprep.subr.bf16.mxu0 %v5775_v55 }
 0x980   :  { %5385 = vmatpush3.bf16.msra.mxu0 %v5741_v6 }
 0x981   :  { %5386 = vmatprep.subr.bf16.mxu0 %v5775_v55 }
 0x984   :  { %5387 = vmatpush3.bf16.msra.mxu0 %v5742_v9 }
 0x985   :  { %5400 = vmatprep.subr.bf16.mxu0 %v5775_v55 }
 0x99a   :  { %v2961_v51 = vpop.f32.mrb[80].mxu0 }
 0x99b   :  { %v5210_v52 = vpop.f32.mrb[81].mxu0 }
 0x99c   :  { %v2964_v56 = vpop.f32.mrb[82].mxu0  ;;  %v5747_v52 = vld [vmem:[%s7091_s20 + $0x20] sm:$0xff]  }
 0x99d   :  { %v5211_v58 = vpop.f32.mrb[83].mxu0  ;;  %v5748_v56 = vld [vmem:[%s7091_s20 + $0x28] sm:$0xff]  }
 0x99e   :  { %v5749_v58 = vld [vmem:[%s7091_s20 + $0x30] sm:$0xff]  }
 0x9a8   :  { %v3366_v34 = vpop.f32.mrb[60].mxu1 }
 0x9a9   :  { %v5290_v62 = vpop.f32.mrb[61].mxu1 }
 0x9aa   :  { %v3369_v63 = vpop.f32.mrb[62].mxu1 }
 0x9ab   :  { %v5291_v0 = vpop.f32.mrb[63].mxu1 }
 0x9ba   :  { %v3049_v3 = vpop.f32.mrb[84].mxu0 }
 0x9bb   :  { %v3050_v4 = vadd.f32 %v3049_v3, %v2961_v51  ;;  %v5230_v5 = vpop.f32.mrb[85].mxu0  ;;  %v5746_v51 = vld [vmem:[%s7091_s20 + $0x18] sm:$0xff]  }
 0x9bc   :  { %v3052_v7 = vpop.f32.mrb[86].mxu0 }
 0x9bd   :  { %v5231_v8 = vpop.f32.mrb[87].mxu0 }
 0x9c8   :  { %v3578_v10 = vpop.f32.mrb[64].mxu1 }
 0x9c9   :  { %v5330_v11 = vpop.f32.mrb[65].mxu1 }
 0x9ca   :  { %v3581_v12 = vpop.f32.mrb[66].mxu1 }
 0x9cb   :  { %v5331_v13 = vpop.f32.mrb[67].mxu1 }
 0x9da   :  { %v3154_v14 = vpop.f32.mrb[88].mxu0 }
 0x9db   :  { %v3160_v15 = vadd.f32 %v3154_v14, %v3050_v4  ;;  %v5250_v16 = vpop.f32.mrb[89].mxu0 }
 0x9dc   :  { %v3157_v17 = vpop.f32.mrb[90].mxu0 }
 0x9dd   :  { %v5251_v18 = vpop.f32.mrb[91].mxu0 }
 0x9e8   :  { %v3790_v19 = vpop.f32.mrb[68].mxu1 }
 0x9e9   :  { %v5370_v20 = vpop.f32.mrb[69].mxu1 }
 0x9ea   :  { %v3793_v21 = vpop.f32.mrb[70].mxu1 }
 0x9eb   :  { %v5371_v22 = vpop.f32.mrb[71].mxu1 }
 0x9f0   :  { %v3956_v25 = vpop.f32.mrb[72].mxu1 }
 0x9f1   :  { %v5398_v24 = vpop.f32.mrb[73].mxu1  ;;  %v3978_v60 = vpack.c.bf16 %v3956_v25, %v3956_v25 }
 0x9f2   :  { %v3959_v26 = vpop.f32.mrb[74].mxu1 }
 0x9f3   :  { %v5399_v27 = vpop.f32.mrb[75].mxu1 }
 0x9fa   :  { %v3260_v28 = vpop.f32.mrb[92].mxu0 }
 0x9fb   :  { %v3266_v29 = vadd.f32 %v3260_v28, %v3160_v15  ;;  %v5270_v30 = vpop.f32.mrb[93].mxu0 }
 0x9fc   :  { %v3263_v31 = vpop.f32.mrb[94].mxu0 }
 0x9fd   :  { %v3372_v54 = vadd.f32 %v3366_v34, %v3266_v29  ;;  %v5271_v53 = vpop.f32.mrb[95].mxu0  ;;  %v5433_v34 = vadd.f32 %v4455_v61, %v4445_v57 }
 0xa1a   :  { %v3472_v32 = vpop.f32.mrb[96].mxu0 }
 0xa1b   :  { %v3478_v23 = vadd.f32 %v3472_v32, %v3372_v54  ;;  %v5310_v33 = vpop.f32.mrb[97].mxu0 }
 0xa1c   :  { %v3475_v35 = vpop.f32.mrb[98].mxu0 }
 0xa1d   :  { %v3584_v36 = vadd.f32 %v3578_v10, %v3478_v23  ;;  %v5311_v37 = vpop.f32.mrb[99].mxu0 }
 0xa3a   :  { %v3684_v38 = vpop.f32.mrb[100].mxu0 }
 0xa3b   :  { %v3690_v39 = vadd.f32 %v3684_v38, %v3584_v36  ;;  %v5350_v40 = vpop.f32.mrb[101].mxu0 }
 0xa3c   :  { %v3687_v42 = vpop.f32.mrb[102].mxu0 }
 0xa3d   :  { %v3796_v44 = vadd.f32 %v3790_v19, %v3690_v39  ;;  %v5351_v45 = vpop.f32.mrb[103].mxu0 }
 0xa3f   :  { %v3804_v48 = vadd.f32 %v4444_v41, %v3796_v44 }
 0xa41   :  { %v3805_v49 = vmax.f32 %v3804_v48, 0.0 }
 0xa43   :  { %v3822_v43 = vpack.c.bf16 %v3805_v49, %v3805_v49 }
 0xa45   :  { %5389 = vmatmul.mubr.bf16.vlgmr.msra.gmra.mrb[104].mxu0 %v3822_v43 }
 0xa46   :  { %5401 = vmatpush3.bf16.msra.mxu0 %v5743_v50  ;;  %5416 = vmatprep.mubr.msk.bf16.mxu0 %vm5776_vm1, %v5775_v55 }
 0xa47   :  { %5402 = vmatprep.subr.bf16.mxu0 %v5775_v55 }
 0xa4a   :  { %5403 = vmatpush3.bf16.msra.mxu0 %v5744_v46 }
 0xa4b   :  { %5404 = vmatprep.subr.bf16.mxu0 %v5775_v55 }
 0xa4e   :  { %5405 = vmatpush3.bf16.msra.mxu0 %v5745_v47 }
 0xa4f   :  { %5406 = vmatprep.subr.bf16.mxu0 %v5775_v55 }
 0xa52   :  { %5407 = vmatpush3.bf16.msra.mxu0 %v5746_v51 }
 0xa53   :  { %5408 = vmatprep.subr.bf16.mxu0 %v5775_v55 }
 0xa56   :  { %5409 = vmatpush3.bf16.msra.mxu0 %v5747_v52 }
 0xa57   :  { %5410 = vmatprep.subr.bf16.mxu0 %v5775_v55 }
 0xa5a   :  { %5411 = vmatpush3.bf16.msra.mxu0 %v5748_v56 }
 0xa5b   :  { %5412 = vmatprep.subr.bf16.mxu0 %v5775_v55 }
 0xa5e   :  { %5413 = vmatpush3.bf16.msra.mxu0 %v5749_v58 }
 0xa5f   :  { %5414 = vmatprep.subr.bf16.mxu0 %v5775_v55  ;;  %v4076_v55 = vld [vmem:[%s7094_s23] sm:$0x3] }
 0xa62   :  { %5415 = vmatpush3.bf16.msra.mxu0 %v5750_v59 }
 0xa65   :  { %5417 = vmatmul.mubr.bf16.vlgmr.msra.gmra.mrb[104].mxu0 %v3978_v60 }
 0xb38   :  { %v4068_v62 = vpop.f32.mrb[104].mxu0 }
 0xb39   :  { %v5434_v63 = vadd.f32 %v5433_v34, %v4068_v62  ;;  %v5418_v0 = vpop.f32.mrb[105].mxu0 }
 0xb3a   :  { %v4071_v1 = vpop.f32.mrb[106].mxu0 }
 0xb3b   :  { %v4075_v2 = vmax.f32 %v5434_v63, 0.0  ;;  %v5419_v3 = vpop.f32.mrb[107].mxu0 }
 0xb3d   :  { %5421 = vmatpush3.msra.mxu1 %v4075_v2 }
 0xb3e   :  { %5423 = vmatmul.mubr.msk.f32.vlgmr.msra.gmra.mrb[76].mxu1 %vm4077_vm2, %v4076_v55 }
 0xc11   :  { %v4147_v4 = vpop.f32.mrb[76].mxu1 }
 0xc12   :  { %4151 = vst [vmem:[#allocation2] sm:$0x3] %v4147_v4  ;;  %v5424_v5 = vpop.f32.mrb[77].mxu1 }
 0xc13   :  { %5762 = shalt.err (!%p5759_p4)
}
 0xc14   :  { %s5763_s23 = scalar_lea.hbm %s7095_s24, 32 }
 0xc15   :  { %p5764_p5 = scmp.ne.s32.totalorder %s7095_s24, %s5763_s23  ;;  %p5767_p6 = scmp.lt.u32.totalorder %s5763_s23, %s7095_s24 }
 0xc17   :  { %p5769_p7 = pnand %p5767_p6, %p5764_p5 }
 0xc19   :  { %5772 = shalt.err (!%p5769_p7)
}
 0xc1a   :  { %4161 = dma.vmem_to_hbm [thread:$0]  %s4159_s19, 32, %s7095_s24, [#allocation3]  }
 0xc1b   :  { %5773 = dma.done.wait [#allocation3], 32  }
 0xc1c   :  { %5774 = vsyncadd [#allocation3], 4294967264 }
 0xc1d   :  { %4165 = vsyncpa [#allocation3], 1 }

</bundles_post_ra>
